<compile_context>
chip_gen: v6e
topology: v6e:2x2x1
jax: 0.10.0
libtpu: 0.0.40
codegen_flags: <defaults>
</compile_context>

<pallas_src>
import jax
import jax.numpy as jnp
from jax.experimental import pallas as pl
from jax.experimental.pallas import tpu as pltpu

H1_PAD = 512      # 500  -> 512  (multiple of 128)
H2_PAD = 1024     # 1000 -> 1024 (multiple of 128)
OUT_PAD = 128     # 2    -> 128  (lane-dense output slab; real classes in cols 0..1)
NUM_CLASSES = 2


def _round_up(v, m):
    return (v + m - 1) // m * m


def _bf16_epilogue_default():
    # v6e/v7x VALUs run packed bf16 at ~2x f32 elementwise throughput; v5e has no bf16 VPU,
    # so keep the f32 epilogue there (and on unknown/older chips).
    try:
        kind = jax.devices()[0].device_kind.lower()
    except Exception:
        return False
    return ("v6" in kind) or ("v7" in kind)


def make_mlp_kernel(bf16_epilogue):
    def mlp_kernel(x_ref, w1_ref, b1_ref, w2_ref, b2_ref, w3_ref, b3_ref, o_ref):
        # no-op cast if the caller already feeds bf16 activations
        x = x_ref[...].astype(jnp.bfloat16)

        # ---- layer 1: Linear(in, 512) + bias + ReLU, fused epilogue feeding next MXU op ----
        acc1 = jnp.dot(x, w1_ref[...], preferred_element_type=jnp.float32)
        if bf16_epilogue:
            h1 = jnp.maximum(acc1.astype(jnp.bfloat16)
                             + b1_ref[...].astype(jnp.bfloat16), 0)
        else:
            h1 = jnp.maximum(acc1 + b1_ref[...], 0.0).astype(jnp.bfloat16)

        # ---- layer 2: Linear(512, 1024) + bias + ReLU ----
        acc2 = jnp.dot(h1, w2_ref[...], preferred_element_type=jnp.float32)
        if bf16_epilogue:
            h2 = jnp.maximum(acc2.astype(jnp.bfloat16)
                             + b2_ref[...].astype(jnp.bfloat16), 0)
        else:
            h2 = jnp.maximum(acc2 + b2_ref[...], 0.0).astype(jnp.bfloat16)

        # ---- layer 3: Linear(1024, 128) — only the first NUM_CLASSES columns are real ----
        # TODO(synk): on v6e/v7x this half-fills the 256-wide MXU with 126 dead columns; if
        # profiling shows the MXU as the binding slot, replace with two VPU/XLU
        # broadcast-multiply + cross-lane-reduce passes over h2.
        logits = jnp.dot(h2, w3_ref[...], preferred_element_type=jnp.float32) + b3_ref[...]

        # log_softmax over the real columns only (mask the 126 padded lanes out of max/sum)
        col = jax.lax.broadcasted_iota(jnp.int32, logits.shape, 1)
        masked = jnp.where(col < NUM_CLASSES, logits, jnp.float32(-1e30))
        m = jnp.max(masked, axis=-1, keepdims=True)
        shifted = masked - m
        lse = jnp.log(jnp.sum(jnp.exp(shifted), axis=-1, keepdims=True))
        # full-width (TB, 128) unmasked lane-dense store; padded cols hold junk, sliced outside
        o_ref[...] = shifted - lse

    return mlp_kernel


def _choose_tiling(B, tb):
    """Pick batch tile TB (multiple of 8) and padded batch Bp.

    Large batches get an EVEN number of grid steps so v7x's two TensorCores both work."""
    TB = min(tb, _round_up(B, 8))
    steps = pl.cdiv(B, TB)
    if steps > 1 and steps % 2 == 1:
        steps += 1
        TB = _round_up(pl.cdiv(B, steps), 8)
    Bp = steps * TB
    return TB, Bp, steps


def _vmem_limit_bytes(TB, in_dim, x_itemsize, param_arrays):
    """Scoped-VMEM budget: resident weights (x2 conservative), double-buffered x/out blocks,
    plus ~16 KiB/row of live intermediates, with 25% margin."""
    resident = sum(int(p.size) * p.dtype.itemsize for p in param_arrays)
    streamed = 2 * TB * in_dim * x_itemsize + 2 * TB * OUT_PAD * 4
    intermediates = TB * 16 * 1024
    est = int(1.25 * (2 * resident + streamed + intermediates)) + (2 << 20)
    return max(min(est, 120 << 20), 32 << 20)


def mlp_forward(x, params, tb=2048, bf16_epilogue=None):
    """x: (B, input_dim) float32 (or bfloat16); params: padded bf16 weights (in,out) + f32 biases.

    Returns (B, 2) float32 log-probabilities."""
    B, in_dim = x.shape
    if bf16_epilogue is None:
        bf16_epilogue = _bf16_epilogue_default()

    TB, Bp, steps = _choose_tiling(B, tb)
    if Bp != B:
        x = jnp.pad(x, ((0, Bp - B), (0, 0)))

    w1, b1, w2, b2, w3, b3 = (params["w1"], params["b1"], params["w2"],
                              params["b2"], params["w3"], params["b3"])

    const = lambda i: (0, 0)   # weights/biases: same block every step -> stay VMEM-resident
    vmem_limit = _vmem_limit_bytes(TB, in_dim, x.dtype.itemsize, (w1, b1, w2, b2, w3, b3))

    out = pl.pallas_call(
        make_mlp_kernel(bf16_epilogue),
        out_shape=jax.ShapeDtypeStruct((Bp, OUT_PAD), jnp.float32),
        grid=(steps,),
        in_specs=[
            pl.BlockSpec((TB, in_dim), lambda i: (i, 0)),   # activations: pipelined over batch
            pl.BlockSpec(w1.shape, const),
            pl.BlockSpec(b1.shape, const),
            pl.BlockSpec(w2.shape, const),
            pl.BlockSpec(b2.shape, const),
            pl.BlockSpec(w3.shape, const),
            pl.BlockSpec(b3.shape, const),
        ],
        out_specs=pl.BlockSpec((TB, OUT_PAD), lambda i: (i, 0)),
        compiler_params=pltpu.CompilerParams(
            dimension_semantics=("parallel",),              # megacore sharding on v7x
            vmem_limit_bytes=vmem_limit),
    )(x, w1, b1, w2, b2, w3, b3)

    return out[:B, :NUM_CLASSES]


def init_params(key, input_dim):
    """PyTorch nn.Linear-style init (U[-1/sqrt(fan_in), 1/sqrt(fan_in)]).

    Returns (kernel_params, ref_params):
      kernel_params: weights transposed to (in,out), zero-padded to lane-friendly shapes,
                     cast to bf16; biases zero-padded, kept f32 (cast in-kernel if needed).
      ref_params:    unpadded f32 copies for a pure-JAX reference check.
    """
    true_dims = [(input_dim, 500), (500, 1000), (1000, 2)]
    pad_dims = [(input_dim, H1_PAD), (H1_PAD, H2_PAD), (H2_PAD, OUT_PAD)]
    params, ref = {}, {}
    keys = jax.random.split(key, 2 * len(true_dims))
    for i, ((fi, fo), (pin, pout)) in enumerate(zip(true_dims, pad_dims)):
        bound = 1.0 / jnp.sqrt(jnp.float32(fi))
        w = jax.random.uniform(keys[2 * i], (fi, fo),
                               minval=-bound, maxval=bound, dtype=jnp.float32)
        b = jax.random.uniform(keys[2 * i + 1], (1, fo),
                               minval=-bound, maxval=bound, dtype=jnp.float32)
        ref[f"w{i + 1}"], ref[f"b{i + 1}"] = w, b
        w_pad = jnp.zeros((pin, pout), jnp.float32).at[:fi, :fo].set(w)
        b_pad = jnp.zeros((1, pout), jnp.float32).at[:, :fo].set(b)
        params[f"w{i + 1}"] = w_pad.astype(jnp.bfloat16)
        params[f"b{i + 1}"] = b_pad
    return params, ref


def mlp_reference(x, ref):
    h1 = jnp.maximum(x @ ref["w1"] + ref["b1"], 0.0)
    h2 = jnp.maximum(h1 @ ref["w2"] + ref["b2"], 0.0)
    logits = h2 @ ref["w3"] + ref["b3"]
    return jax.nn.log_softmax(logits, axis=-1)


if __name__ == "__main__":
    key = jax.random.PRNGKey(0)
    k_x, k_p = jax.random.split(key)

    batch, input_dim = 8, 32
    x = jax.random.normal(k_x, (batch, input_dim), dtype=jnp.float32)
    params, ref_params = init_params(k_p, input_dim)

    logits = mlp_forward(x, params)
    jax.block_until_ready(logits)

    assert logits.shape == (batch, NUM_CLASSES)

    # sanity 1: log_softmax rows sum (in prob space) to 1
    probs_sum = jnp.sum(jnp.exp(logits), axis=-1)
    assert jnp.allclose(probs_sum, 1.0, atol=1e-5)

    # sanity 2: matches pure-JAX f32 reference (loose tol: kernel uses bf16 MXU inputs)
    ref_logits = mlp_reference(x, ref_params)
    assert jnp.allclose(logits, ref_logits, atol=1e-1), (
        float(jnp.max(jnp.abs(logits - ref_logits))))

    print("KERNEL_OK")
</pallas_src>

<mosaic_0001>
module attributes {stable_mosaic.version = 11 : i64} {
  func.func @mlp_kernel(%arg0: i32, %arg1: memref<8x32xf32, #tpu.memory_space<vmem>>, %arg2: memref<32x512xbf16, #tpu.memory_space<vmem>>, %arg3: memref<1x512xf32, #tpu.memory_space<vmem>>, %arg4: memref<512x1024xbf16, #tpu.memory_space<vmem>>, %arg5: memref<1x1024xf32, #tpu.memory_space<vmem>>, %arg6: memref<1024x128xbf16, #tpu.memory_space<vmem>>, %arg7: memref<1x128xf32, #tpu.memory_space<vmem>>, %arg8: memref<8x128xf32, #tpu.memory_space<vmem>>) attributes {dimension_semantics = [#tpu.dimension_semantics<parallel>], iteration_bounds = array<i64: 1>, scalar_prefetch = 0 : i64, scratch_operands = 0 : i64, tpu.core_type = #tpu.core_type<tc>, window_params = [{transform_indices = @transform_0, window_bounds = array<i64: 8, 32>}, {pipeline_mode = #tpu.pipeline_mode<synchronous>, transform_indices = @transform_1, window_bounds = array<i64: 32, 512>}, {pipeline_mode = #tpu.pipeline_mode<synchronous>, transform_indices = @transform_2, window_bounds = array<i64: 1, 512>}, {pipeline_mode = #tpu.pipeline_mode<synchronous>, transform_indices = @transform_3, window_bounds = array<i64: 512, 1024>}, {pipeline_mode = #tpu.pipeline_mode<synchronous>, transform_indices = @transform_4, window_bounds = array<i64: 1, 1024>}, {pipeline_mode = #tpu.pipeline_mode<synchronous>, transform_indices = @transform_5, window_bounds = array<i64: 1024, 128>}, {pipeline_mode = #tpu.pipeline_mode<synchronous>, transform_indices = @transform_6, window_bounds = array<i64: 1, 128>}, {transform_indices = @transform_7, window_bounds = array<i64: 8, 128>}]} {
    %c0 = arith.constant 0 : index
    %c0_0 = arith.constant 0 : index
    %0 = vector.load %arg1[%c0, %c0_0] : memref<8x32xf32, #tpu.memory_space<vmem>>, vector<8x32xf32>
    %1 = arith.truncf %0 : vector<8x32xf32> to vector<8x32xbf16>
    %c0_1 = arith.constant 0 : index
    %c0_2 = arith.constant 0 : index
    %2 = vector.load %arg2[%c0_1, %c0_2] : memref<32x512xbf16, #tpu.memory_space<vmem>>, vector<32x512xbf16>
    %cst = arith.constant dense<0.000000e+00> : vector<8x512xf32>
    %3 = tpu.matmul %1, %2, %cst {dimension_numbers = #tpu.dot_dimension_numbers<[1], [0], [0], [1], [0, 0, 1, 1], [], []>} : vector<8x32xbf16>, vector<32x512xbf16>, vector<8x512xf32> -> vector<8x512xf32>
    %c0_3 = arith.constant 0 : index
    %c0_4 = arith.constant 0 : index
    %4 = vector.load %arg3[%c0_3, %c0_4] : memref<1x512xf32, #tpu.memory_space<vmem>>, vector<1x512xf32>
    %5 = vector.broadcast %4 : vector<1x512xf32> to vector<8x512xf32>
    %6 = arith.addf %3, %5 : vector<8x512xf32>
    %cst_5 = arith.constant 0.000000e+00 : f32
    %7 = vector.broadcast %cst_5 : f32 to vector<8x512xf32>
    %8 = arith.maximumf %6, %7 : vector<8x512xf32>
    %9 = arith.truncf %8 : vector<8x512xf32> to vector<8x512xbf16>
    %c0_6 = arith.constant 0 : index
    %c0_7 = arith.constant 0 : index
    %10 = vector.load %arg4[%c0_6, %c0_7] : memref<512x1024xbf16, #tpu.memory_space<vmem>>, vector<512x1024xbf16>
    %cst_8 = arith.constant dense<0.000000e+00> : vector<8x1024xf32>
    %11 = tpu.matmul %9, %10, %cst_8 {dimension_numbers = #tpu.dot_dimension_numbers<[1], [0], [0], [1], [0, 0, 1, 1], [], []>} : vector<8x512xbf16>, vector<512x1024xbf16>, vector<8x1024xf32> -> vector<8x1024xf32>
    %c0_9 = arith.constant 0 : index
    %c0_10 = arith.constant 0 : index
    %12 = vector.load %arg5[%c0_9, %c0_10] : memref<1x1024xf32, #tpu.memory_space<vmem>>, vector<1x1024xf32>
    %13 = vector.broadcast %12 : vector<1x1024xf32> to vector<8x1024xf32>
    %14 = arith.addf %11, %13 : vector<8x1024xf32>
    %cst_11 = arith.constant 0.000000e+00 : f32
    %15 = vector.broadcast %cst_11 : f32 to vector<8x1024xf32>
    %16 = arith.maximumf %14, %15 : vector<8x1024xf32>
    %17 = arith.truncf %16 : vector<8x1024xf32> to vector<8x1024xbf16>
    %c0_12 = arith.constant 0 : index
    %c0_13 = arith.constant 0 : index
    %18 = vector.load %arg6[%c0_12, %c0_13] : memref<1024x128xbf16, #tpu.memory_space<vmem>>, vector<1024x128xbf16>
    %cst_14 = arith.constant dense<0.000000e+00> : vector<8x128xf32>
    %19 = tpu.matmul %17, %18, %cst_14 {dimension_numbers = #tpu.dot_dimension_numbers<[1], [0], [0], [1], [0, 0, 1, 1], [], []>} : vector<8x1024xbf16>, vector<1024x128xbf16>, vector<8x128xf32> -> vector<8x128xf32>
    %c0_15 = arith.constant 0 : index
    %c0_16 = arith.constant 0 : index
    %20 = vector.load %arg7[%c0_15, %c0_16] : memref<1x128xf32, #tpu.memory_space<vmem>>, vector<1x128xf32>
    %21 = vector.broadcast %20 : vector<1x128xf32> to vector<8x128xf32>
    %22 = arith.addf %19, %21 : vector<8x128xf32>
    %23 = tpu.iota {dimensions = array<i32: 1>} : vector<8x128xi32>
    %c2_i32 = arith.constant 2 : i32
    %24 = vector.broadcast %c2_i32 : i32 to vector<8x128xi32>
    %25 = arith.cmpi slt, %23, %24 : vector<8x128xi32>
    %cst_17 = arith.constant -1.000000e+30 : f32
    %26 = vector.broadcast %cst_17 : f32 to vector<8x128xf32>
    %27 = arith.select %25, %22, %26 : vector<8x128xi1>, vector<8x128xf32>
    %cst_18 = arith.constant dense<0xFF800000> : vector<8xf32>
    %28 = vector.multi_reduction <maximumf>, %27, %cst_18 [1] : vector<8x128xf32> to vector<8xf32>
    %29 = vector.shape_cast %28 : vector<8xf32> to vector<8x1xf32>
    %30 = vector.broadcast %29 : vector<8x1xf32> to vector<8x128xf32>
    %31 = arith.subf %27, %30 : vector<8x128xf32>
    %32 = math.exp %31 : vector<8x128xf32>
    %cst_19 = arith.constant dense<0.000000e+00> : vector<8xf32>
    %33 = vector.multi_reduction <add>, %32, %cst_19 [1] : vector<8x128xf32> to vector<8xf32>
    %34 = vector.shape_cast %33 : vector<8xf32> to vector<8x1xf32>
    %35 = math.log %34 : vector<8x1xf32>
    %36 = vector.broadcast %35 : vector<8x1xf32> to vector<8x128xf32>
    %37 = arith.subf %31, %36 : vector<8x128xf32>
    %c0_20 = arith.constant 0 : index
    %c0_21 = arith.constant 0 : index
    %38 = vector.load %arg8[%c0_20, %c0_21] : memref<8x128xf32, #tpu.memory_space<vmem>>, vector<8x128xf32>
    tpu.vector_store %arg8[%c0_20, %c0_21], %37 {strides = array<i32>} : memref<8x128xf32, #tpu.memory_space<vmem>>, vector<8x128xf32>,
    return
  }
  func.func @transform_0(%arg0: i32) -> (i32, i32) {
    %c0_i32 = arith.constant 0 : i32
    %c0_i32_0 = arith.constant 0 : i32
    return %arg0, %c0_i32 : i32, i32
  }
  func.func @transform_1(%arg0: i32) -> (i32, i32) {
    %c0_i32 = arith.constant 0 : i32
    %c0_i32_0 = arith.constant 0 : i32
    %c0_i32_1 = arith.constant 0 : i32
    return %c0_i32, %c0_i32_0 : i32, i32
  }
  func.func @transform_2(%arg0: i32) -> (i32, i32) {
    %c0_i32 = arith.constant 0 : i32
    %c0_i32_0 = arith.constant 0 : i32
    %c0_i32_1 = arith.constant 0 : i32
    return %c0_i32, %c0_i32_0 : i32, i32
  }
  func.func @transform_3(%arg0: i32) -> (i32, i32) {
    %c0_i32 = arith.constant 0 : i32
    %c0_i32_0 = arith.constant 0 : i32
    %c0_i32_1 = arith.constant 0 : i32
    return %c0_i32, %c0_i32_0 : i32, i32
  }
  func.func @transform_4(%arg0: i32) -> (i32, i32) {
    %c0_i32 = arith.constant 0 : i32
    %c0_i32_0 = arith.constant 0 : i32
    %c0_i32_1 = arith.constant 0 : i32
    return %c0_i32, %c0_i32_0 : i32, i32
  }
  func.func @transform_5(%arg0: i32) -> (i32, i32) {
    %c0_i32 = arith.constant 0 : i32
    %c0_i32_0 = arith.constant 0 : i32
    %c0_i32_1 = arith.constant 0 : i32
    return %c0_i32, %c0_i32_0 : i32, i32
  }
  func.func @transform_6(%arg0: i32) -> (i32, i32) {
    %c0_i32 = arith.constant 0 : i32
    %c0_i32_0 = arith.constant 0 : i32
    %c0_i32_1 = arith.constant 0 : i32
    return %c0_i32, %c0_i32_0 : i32, i32
  }
  func.func @transform_7(%arg0: i32) -> (i32, i32) {
    %c0_i32 = arith.constant 0 : i32
    %c0_i32_0 = arith.constant 0 : i32
    return %arg0, %c0_i32 : i32, i32
  }
}

</mosaic_0001>

<bundles_post_ra>
// kernel: tpu_custom_call.1
= control target key start
LH: loop header
LB: loop body
LE: loop exit
PB: predicated region body
PF: predicated region fallthrough
CT: control target
= control target key end

     0   :  { %12 = vsyncpa [#allocation3], 0  ;;  %s3707_s0 = inlined_call_operand.hbm [shape: f32[8,32], index: 0, kind: input, shape index: {}]   ;;  %s3708_s1 = inlined_call_operand.hbm [shape: bf16[32,512], index: 1, kind: input, shape index: {}]   ;;  %s3709_s2 = inlined_call_operand.hbm [shape: f32[1,512], index: 2, kind: input, shape index: {}]   ;;  %s3710_s3 = inlined_call_operand.hbm [shape: bf16[512,1024], index: 3, kind: input, shape index: {}]   ;;  %s3711_s4 = inlined_call_operand.hbm [shape: f32[1,1024], index: 4, kind: input, shape index: {}]   ;;  %s3712_s5 = inlined_call_operand.hbm [shape: bf16[1024,128], index: 5, kind: input, shape index: {}]   ;;  %s3713_s6 = inlined_call_operand.vmem [shape: f32[1,128], index: 6, kind: input, shape index: {}]   ;;  %s3714_s7 = inlined_call_operand.hbm [shape: f32[8,128], index: 7, kind: output, shape index: {}]  }
   0x1   :  { %13 = vsyncpa [#allocation6], 0 }
   0x2   :  { %14 = vsyncpa [#allocation9], 0 }
   0x3   :  { %15 = vsyncpa [#allocation12], 0 }
   0x4   :  { %16 = vsyncpa [#allocation4], 0  ;;  %s3567_s24 = smov [#allocation5]  }
   0x5   :  { %s32_s25 = sshll.u32 %s3567_s24, 4  ;;  %s33_s25 = int_to_ptr.vmem [resolvable:$true] %s32_s25 }
   0x6   :  { %s3425_s26 = scalar_lea.vmem %s33_s25, 1024  ;;  %p3430_p1 = scmp.lt.s32.totalorder %s33_s25, %s33_s25 }
   0x7   :  { %p3426_p0 = scmp.ne.s32.totalorder %s33_s25, %s3425_s26  ;;  %p3431_p2 = scmp.lt.s32.totalorder %s3425_s26, %s3425_s26 }
   0x9   :  { %p3432_p3 = por %p3431_p2, %p3430_p1 }
   0xb   :  { %p3433_p4 = pnand %p3432_p3, %p3426_p0 }
   0xd   :  { %3436 = shalt.err (!%p3433_p4)
}
   0xe   :  { %s3568_s27 = smov 256   ;;  %s3569_s28 = smov 16  }
   0xf   :  { %38 = dma.hbm_to_vmem [thread:$0]  %s3708_s1, 1024, %s33_s25, [#allocation6], %s3568_s27, %s3568_s27, %s3569_s28  }
  0x10   :  { %s3570_s8 = smov [#allocation8]  }
  0x11   :  { %s54_s9 = sshll.u32 %s3570_s8, 4  ;;  %s55_s9 = int_to_ptr.vmem [resolvable:$true] %s54_s9 }
  0x12   :  { %s3445_s10 = scalar_lea.vmem %s55_s9, 32768  ;;  %p3450_p6 = scmp.lt.s32.totalorder %s55_s9, %s55_s9 }
  0x13   :  { %p3446_p5 = scmp.ne.s32.totalorder %s55_s9, %s3445_s10  ;;  %p3451_p7 = scmp.lt.s32.totalorder %s3445_s10, %s3445_s10 }
  0x15   :  { %p3452_p8 = por %p3451_p7, %p3450_p6 }
  0x17   :  { %p3453_p9 = pnand %p3452_p8, %p3446_p5 }
  0x19   :  { %3456 = shalt.err (!%p3453_p9)
}
  0x1a   :  { %s3571_s11 = smov 512   ;;  %s3572_s12 = smov 32  }
  0x1b   :  { %60 = dma.hbm_to_vmem [thread:$0]  %s3710_s3, 32768, %s55_s9, [#allocation9], %s3571_s11, %s3571_s11, %s3572_s12  }
  0x1c   :  { %s3573_s15 = smov [#allocation2]   ;;  %s3574_s17 = smov [#allocation7]  }
  0x1d   :  { %s23_s16 = sshll.u32 %s3573_s15, 4  ;;  %s45_s1 = sshll.u32 %s3574_s17, 4  ;;  %s24_s16 = int_to_ptr.vmem [resolvable:$true] %s23_s16  ;;  %s46_s1 = int_to_ptr.vmem [resolvable:$true] %s45_s1 }
  0x1e   :  { %s3465_s18 = scalar_lea.vmem %s24_s16, 128  ;;  %p3470_p11 = scmp.lt.s32.totalorder %s24_s16, %s24_s16 }
  0x1f   :  { %p3466_p10 = scmp.ne.s32.totalorder %s24_s16, %s3465_s18  ;;  %p3471_p12 = scmp.lt.s32.totalorder %s3465_s18, %s3465_s18 }
  0x21   :  { %p3472_p13 = por %p3471_p12, %p3470_p11 }
  0x23   :  { %p3473_p0 = pnand %p3472_p13, %p3466_p10 }
  0x25   :  { %3476 = shalt.err (!%p3473_p0)
}
  0x26   :  { %26 = dma.hbm_to_vmem [thread:$0]  %s3707_s0, 128, %s24_s16, [#allocation3]  }
  0x27   :  { %s3485_s21 = scalar_lea.vmem %s46_s1, 64  ;;  %p3490_p2 = scmp.lt.s32.totalorder %s46_s1, %s46_s1 }
  0x28   :  { %p3486_p1 = scmp.ne.s32.totalorder %s46_s1, %s3485_s21  ;;  %p3491_p3 = scmp.lt.s32.totalorder %s3485_s21, %s3485_s21 }
  0x2a   :  { %p3492_p4 = por %p3491_p3, %p3490_p2 }
  0x2c   :  { %p3493_p5 = pnand %p3492_p4, %p3486_p1 }
  0x2e   :  { %3496 = shalt.err (!%p3493_p5)
}
  0x2f   :  { %48 = dma.hbm_to_vmem [thread:$0]  %s3709_s2, 64, %s46_s1, [#allocation6]  }
  0x30   :  { %s3575_s23 = smov [#allocation10]   ;;  %s3576_s25 = smov [#allocation11]  }
  0x31   :  { %s67_s24 = sshll.u32 %s3575_s23, 4  ;;  %s76_s26 = sshll.u32 %s3576_s25, 4  ;;  %s68_s24 = int_to_ptr.vmem [resolvable:$true] %s67_s24  ;;  %s77_s26 = int_to_ptr.vmem [resolvable:$true] %s76_s26 }
  0x32   :  { %s3505_s27 = scalar_lea.vmem %s68_s24, 128  ;;  %p3510_p7 = scmp.lt.s32.totalorder %s68_s24, %s68_s24 }
  0x33   :  { %p3506_p6 = scmp.ne.s32.totalorder %s68_s24, %s3505_s27  ;;  %p3511_p8 = scmp.lt.s32.totalorder %s3505_s27, %s3505_s27 }
  0x35   :  { %p3512_p9 = por %p3511_p8, %p3510_p7 }
  0x37   :  { %p3513_p10 = pnand %p3512_p9, %p3506_p6 }
  0x39   :  { %3516 = shalt.err (!%p3513_p10)
}
  0x3a   :  { %70 = dma.hbm_to_vmem [thread:$0]  %s3711_s4, 128, %s68_s24, [#allocation9]  }
  0x3b   :  { %s3525_s29 = scalar_lea.vmem %s77_s26, 8192  ;;  %p3530_p12 = scmp.lt.s32.totalorder %s77_s26, %s77_s26 }
  0x3c   :  { %p3526_p11 = scmp.ne.s32.totalorder %s77_s26, %s3525_s29  ;;  %p3531_p13 = scmp.lt.s32.totalorder %s3525_s29, %s3525_s29 }
  0x3e   :  { %p3532_p0 = por %p3531_p13, %p3530_p12 }
  0x40   :  { %p3533_p1 = pnand %p3532_p0, %p3526_p11 }
  0x42   :  { %3536 = shalt.err (!%p3533_p1)
}
  0x43   :  { %s3577_s2 = smov 64   ;;  %s3578_s30 = smov 4  }
  0x44   :  { %82 = dma.hbm_to_vmem [thread:$0]  %s3712_s5, 8192, %s77_s26, [#allocation12], %s3577_s2, %s3577_s2, %s3578_s30  }
  0x45   :  { %3557 = dma.done.wait [#allocation3], 128  }
  0x46   :  { %3558 = vsyncadd [#allocation3], 4294967168 }
  0x47   :  { %3559 = dma.done.wait [#allocation6], 1088  }
  0x48   :  { %3560 = vsyncadd [#allocation6], 4294966208 }
  0x49   :  { %3561 = dma.done.wait [#allocation9], 32896  }
  0x4a   :  { %3562 = vsyncadd [#allocation9], 4294934400 }
  0x4b   :  { %3563 = dma.done.wait [#allocation12], 8192  }
  0x4c   :  { %3564 = vsyncadd [#allocation12], 4294959104  ;;  %v3579_v0 = vmov 0   ;;  %v3337_v1 = vld [vmem:[#allocation5 + $0x24] ss:$16 sps:$4 sm:$0xff]   ;;  %v104_v9 = vld [vmem:[#allocation2] sm:$0xff] }
  0x4d   :  { %212 = vmatprep.mubr.bf16.mxu0 %v3579_v0  ;;  %253 = vmatprep.mubr.bf16.mxu1 %v3579_v0  ;;  %v3339_v2 = vld [vmem:[#allocation5 + $0x2c] ss:$16 sps:$4 sm:$0xff]   ;;  %v3341_v3 = vld [vmem:[#allocation5 + $0x20] ss:$16 sps:$4 sm:$0xff]   ;;  %v3342_v4 = vld [vmem:[#allocation5 + $0x28] ss:$16 sps:$4 sm:$0xff]   ;;  %v105_v14 = vpack.c.bf16 %v104_v9, %v104_v9 }
  0x4e   :  { %192 = vmatprep.subr.bf16.mxu0 %v3337_v1  ;;  %233 = vmatprep.subr.bf16.mxu1 %v3339_v2  ;;  %v3343_v5 = vld [vmem:[#allocation5 + $0x4] ss:$16 sps:$4 sm:$0xff]   ;;  %v3345_v6 = vld [vmem:[#allocation5 + $0xc] ss:$16 sps:$4 sm:$0xff]   ;;  %v3347_v7 = vld [vmem:[#allocation5] ss:$16 sps:$4 sm:$0xff]  }
  0x4f   :  { %193 = vmatpush1.bf16.msra.mxu0 %v3341_v3  ;;  %234 = vmatpush1.bf16.msra.mxu1 %v3342_v4  ;;  %v3348_v8 = vld [vmem:[#allocation5 + $0x8] ss:$16 sps:$4 sm:$0xff]   ;;  %vm176_vm0 = vcmask 261120  }
  0x50   :  { %194 = vmatprep.subr.bf16.mxu0 %v3343_v5  ;;  %v326_v10 = vld [vmem:[#allocation8 + $0x1c0] sm:$0xff]  ;;  %235 = vmatprep.subr.bf16.mxu1 %v3345_v6 }
  0x51   :  { %v330_v11 = vld [vmem:[#allocation8 + $0x1e0] sm:$0xff] }
  0x52   :  { %v454_v12 = vld [vmem:[#allocation8 + $0x5c0] sm:$0xff]  ;;  %v2971_v15 = vcombine.high %v326_v10, %v330_v11  ;;  %v2970_v20 = vcombine.low %v326_v10, %v330_v11 }
  0x53   :  { %v458_v13 = vld [vmem:[#allocation8 + $0x5e0] sm:$0xff]  ;;  %195 = vmatpush1.bf16.msra.mxu0 %v3347_v7  ;;  %236 = vmatpush1.bf16.msra.mxu1 %v3348_v8 }
  0x54   :  { %v3099_v16 = vcombine.high %v454_v12, %v458_v13  ;;  %v318_v17 = vld [vmem:[#allocation8 + $0x180] sm:$0xff]  ;;  %v3098_v21 = vcombine.low %v454_v12, %v458_v13  ;;  %1848 = vmatprep.subr.bf16.mxu0 %v2971_v15 }
  0x55   :  { %v322_v18 = vld [vmem:[#allocation8 + $0x1a0] sm:$0xff] }
  0x56   :  { %v446_v19 = vld [vmem:[#allocation8 + $0x580] sm:$0xff]  ;;  %1889 = vmatprep.subr.bf16.mxu1 %v3099_v16  ;;  %v2963_v23 = vcombine.high %v318_v17, %v322_v18  ;;  %2912 = vmatmul.mubr.msk.bf16.vlgmr.msra.gmra.mxu0 %vm176_vm0, %v105_v14  ;;  %v2962_v29 = vcombine.low %v318_v17, %v322_v18 }
  0x57   :  { %v450_v22 = vld [vmem:[#allocation8 + $0x5a0] sm:$0xff]  ;;  %2913 = vmatmul.mubr.msk.bf16.vlgmr.msra.gmra.mxu1 %vm176_vm0, %v105_v14  ;;  %1849 = vmatpush1.bf16.msra.mxu0 %v2970_v20 }
  0x58   :  { %v3091_v24 = vcombine.high %v446_v19, %v450_v22  ;;  %v310_v25 = vld [vmem:[#allocation8 + $0x140] sm:$0xff]  ;;  %1890 = vmatpush1.bf16.msra.mxu1 %v3098_v21  ;;  %v3090_v30 = vcombine.low %v446_v19, %v450_v22  ;;  %1850 = vmatprep.subr.bf16.mxu0 %v2963_v23 }
  0x59   :  { %v314_v26 = vld [vmem:[#allocation8 + $0x160] sm:$0xff] }
  0x5a   :  { %v438_v27 = vld [vmem:[#allocation8 + $0x540] sm:$0xff]  ;;  %1891 = vmatprep.subr.bf16.mxu1 %v3091_v24  ;;  %v2955_v31 = vcombine.high %v310_v25, %v314_v26  ;;  %v2954_v37 = vcombine.low %v310_v25, %v314_v26 }
  0x5b   :  { %v442_v28 = vld [vmem:[#allocation8 + $0x560] sm:$0xff]  ;;  %1851 = vmatpush1.bf16.msra.mxu0 %v2962_v29 }
  0x5c   :  { %v3083_v32 = vcombine.high %v438_v27, %v442_v28  ;;  %v302_v33 = vld [vmem:[#allocation8 + $0x100] sm:$0xff]  ;;  %1892 = vmatpush1.bf16.msra.mxu1 %v3090_v30  ;;  %v3082_v38 = vcombine.low %v438_v27, %v442_v28  ;;  %1852 = vmatprep.subr.bf16.mxu0 %v2955_v31 }
  0x5d   :  { %v306_v34 = vld [vmem:[#allocation8 + $0x120] sm:$0xff] }
  0x5e   :  { %v430_v35 = vld [vmem:[#allocation8 + $0x500] sm:$0xff]  ;;  %1893 = vmatprep.subr.bf16.mxu1 %v3083_v32  ;;  %v2947_v39 = vcombine.high %v302_v33, %v306_v34  ;;  %v2946_v45 = vcombine.low %v302_v33, %v306_v34 }
  0x5f   :  { %v434_v36 = vld [vmem:[#allocation8 + $0x520] sm:$0xff]  ;;  %1853 = vmatpush1.bf16.msra.mxu0 %v2954_v37 }
  0x60   :  { %v3075_v40 = vcombine.high %v430_v35, %v434_v36  ;;  %v294_v41 = vld [vmem:[#allocation8 + $0xc0] sm:$0xff]  ;;  %1894 = vmatpush1.bf16.msra.mxu1 %v3082_v38  ;;  %v3074_v46 = vcombine.low %v430_v35, %v434_v36  ;;  %1854 = vmatprep.subr.bf16.mxu0 %v2947_v39 }
  0x61   :  { %v298_v42 = vld [vmem:[#allocation8 + $0xe0] sm:$0xff] }
  0x62   :  { %v422_v43 = vld [vmem:[#allocation8 + $0x4c0] sm:$0xff]  ;;  %1895 = vmatprep.subr.bf16.mxu1 %v3075_v40  ;;  %v2939_v47 = vcombine.high %v294_v41, %v298_v42  ;;  %v2938_v53 = vcombine.low %v294_v41, %v298_v42 }
  0x63   :  { %v426_v44 = vld [vmem:[#allocation8 + $0x4e0] sm:$0xff]  ;;  %1855 = vmatpush1.bf16.msra.mxu0 %v2946_v45 }
  0x64   :  { %v3067_v48 = vcombine.high %v422_v43, %v426_v44  ;;  %v286_v49 = vld [vmem:[#allocation8 + $0x80] sm:$0xff]  ;;  %1896 = vmatpush1.bf16.msra.mxu1 %v3074_v46  ;;  %v3066_v54 = vcombine.low %v422_v43, %v426_v44  ;;  %1856 = vmatprep.subr.bf16.mxu0 %v2939_v47 }
  0x65   :  { %v290_v50 = vld [vmem:[#allocation8 + $0xa0] sm:$0xff] }
  0x66   :  { %v414_v51 = vld [vmem:[#allocation8 + $0x480] sm:$0xff]  ;;  %1897 = vmatprep.subr.bf16.mxu1 %v3067_v48  ;;  %v2931_v59 = vcombine.high %v286_v49, %v290_v50  ;;  %v2930_v61 = vcombine.low %v286_v49, %v290_v50 }
  0x67   :  { %v418_v52 = vld [vmem:[#allocation8 + $0x4a0] sm:$0xff]  ;;  %1857 = vmatpush1.bf16.msra.mxu0 %v2938_v53 }
  0x68   :  { %v278_v55 = vld [vmem:[#allocation8 + $0x40] sm:$0xff]  ;;  %v3059_v60 = vcombine.high %v414_v51, %v418_v52  ;;  %1898 = vmatpush1.bf16.msra.mxu1 %v3066_v54  ;;  %v3058_v62 = vcombine.low %v414_v51, %v418_v52  ;;  %1858 = vmatprep.subr.bf16.mxu0 %v2931_v59 }
  0x69   :  { %v282_v56 = vld [vmem:[#allocation8 + $0x60] sm:$0xff] }
  0x6a   :  { %v406_v57 = vld [vmem:[#allocation8 + $0x440] sm:$0xff]  ;;  %1899 = vmatprep.subr.bf16.mxu1 %v3059_v60  ;;  %v2923_v3 = vcombine.high %v278_v55, %v282_v56  ;;  %v2922_v5 = vcombine.low %v278_v55, %v282_v56 }
  0x6b   :  { %v410_v58 = vld [vmem:[#allocation8 + $0x460] sm:$0xff]  ;;  %1859 = vmatpush1.bf16.msra.mxu0 %v2930_v61 }
  0x6c   :  { %v270_v63 = vld [vmem:[#allocation8] sm:$0xff]  ;;  %v3051_v4 = vcombine.high %v406_v57, %v410_v58  ;;  %1900 = vmatpush1.bf16.msra.mxu1 %v3058_v62  ;;  %v3050_v6 = vcombine.low %v406_v57, %v410_v58  ;;  %1860 = vmatprep.subr.bf16.mxu0 %v2923_v3 }
  0x6d   :  { %v274_v0 = vld [vmem:[#allocation8 + $0x20] sm:$0xff] }
  0x6e   :  { %v398_v1 = vld [vmem:[#allocation8 + $0x400] sm:$0xff]  ;;  %1901 = vmatprep.subr.bf16.mxu1 %v3051_v4  ;;  %v2915_v11 = vcombine.high %v270_v63, %v274_v0  ;;  %v2914_v13 = vcombine.low %v270_v63, %v274_v0 }
  0x6f   :  { %v402_v2 = vld [vmem:[#allocation8 + $0x420] sm:$0xff]  ;;  %1861 = vmatpush1.bf16.msra.mxu0 %v2922_v5 }
  0x70   :  { %v390_v7 = vld [vmem:[#allocation8 + $0x3c0] sm:$0xff]  ;;  %v3043_v12 = vcombine.high %v398_v1, %v402_v2  ;;  %1902 = vmatpush1.bf16.msra.mxu1 %v3050_v6  ;;  %v3042_v14 = vcombine.low %v398_v1, %v402_v2  ;;  %1862 = vmatprep.subr.bf16.mxu0 %v2915_v11  ;;  %v327_v11 = vld [vmem:[#allocation8 + $0x1c8] sm:$0xff] }
  0x71   :  { %v394_v8 = vld [vmem:[#allocation8 + $0x3e0] sm:$0xff] }
  0x72   :  { %v518_v9 = vld [vmem:[#allocation8 + $0x7c0] sm:$0xff]  ;;  %1903 = vmatprep.subr.bf16.mxu1 %v3043_v12  ;;  %v3035_v19 = vcombine.high %v390_v7, %v394_v8  ;;  %v3034_v21 = vcombine.low %v390_v7, %v394_v8  ;;  %v331_v12 = vld [vmem:[#allocation8 + $0x1e8] sm:$0xff] }
  0x73   :  { %v522_v10 = vld [vmem:[#allocation8 + $0x7e0] sm:$0xff]  ;;  %1863 = vmatpush1.bf16.msra.mxu0 %v2914_v13  ;;  %v455_v13 = vld [vmem:[#allocation8 + $0x5c8] sm:$0xff] }
  0x74   :  { %v382_v15 = vld [vmem:[#allocation8 + $0x380] sm:$0xff]  ;;  %v3163_v20 = vcombine.high %v518_v9, %v522_v10  ;;  %1904 = vmatpush1.bf16.msra.mxu1 %v3042_v14  ;;  %v3162_v22 = vcombine.low %v518_v9, %v522_v10  ;;  %1864 = vmatprep.subr.bf16.mxu0 %v3035_v19  ;;  %v2973_v14 = vcombine.high %v327_v11, %v331_v12  ;;  %v116_v19 = vlaneseq }
  0x75   :  { %v386_v16 = vld [vmem:[#allocation8 + $0x3a0] sm:$0xff] }
  0x76   :  { %v510_v17 = vld [vmem:[#allocation8 + $0x780] sm:$0xff]  ;;  %1905 = vmatprep.subr.bf16.mxu1 %v3163_v20  ;;  %v3027_v27 = vcombine.high %v382_v15, %v386_v16  ;;  %v3026_v29 = vcombine.low %v382_v15, %v386_v16  ;;  %v459_v15 = vld [vmem:[#allocation8 + $0x5e8] sm:$0xff]  ;;  %v2972_v16 = vcombine.low %v327_v11, %v331_v12  ;;  %v3640_v20 = vshrl.u32 %v116_v19, 7 }
  0x77   :  { %v514_v18 = vld [vmem:[#allocation8 + $0x7a0] sm:$0xff]  ;;  %1865 = vmatpush2.bf16.msra.mxu0 %v3034_v21  ;;  %v427_v11 = vld [vmem:[#allocation8 + $0x4e8] sm:$0xff] }
  0x78   :  { %v374_v23 = vld [vmem:[#allocation8 + $0x340] sm:$0xff]  ;;  %v3155_v28 = vcombine.high %v510_v17, %v514_v18  ;;  %1906 = vmatpush2.bf16.msra.mxu1 %v3162_v22  ;;  %v3154_v30 = vcombine.low %v510_v17, %v514_v18  ;;  %1866 = vmatprep.subr.bf16.mxu0 %v3027_v27  ;;  %v3100_v17 = vcombine.low %v455_v13, %v459_v15  ;;  %v118_v21 = vsub.s32 0, %v3640_v20 }
  0x79   :  { %v378_v24 = vld [vmem:[#allocation8 + $0x360] sm:$0xff]  ;;  %v3101_v18 = vcombine.high %v455_v13, %v459_v15  ;;  %v126_v22 = vsub.s32 2, %v3640_v20 }
  0x7a   :  { %v502_v25 = vld [vmem:[#allocation8 + $0x740] sm:$0xff]  ;;  %1907 = vmatprep.subr.bf16.mxu1 %v3155_v28  ;;  %v3019_v35 = vcombine.high %v374_v23, %v378_v24  ;;  %v3018_v37 = vcombine.low %v374_v23, %v378_v24  ;;  %v114_v23 = vld [vmem:[#allocation7] sm:$0xf]  ;;  %v122_v24 = vsub.s32 1, %v3640_v20 }
  0x7b   :  { %v506_v26 = vld [vmem:[#allocation8 + $0x760] sm:$0xff]  ;;  %1867 = vmatpush2.bf16.msra.mxu0 %v3026_v29  ;;  %v127_v27 = vrot.slane %v114_v23, %v126_v22 }
  0x7c   :  { %v366_v31 = vld [vmem:[#allocation8 + $0x300] sm:$0xff]  ;;  %v3147_v36 = vcombine.high %v502_v25, %v506_v26  ;;  %1908 = vmatpush2.bf16.msra.mxu1 %v3154_v30  ;;  %v3146_v38 = vcombine.low %v502_v25, %v506_v26  ;;  %1868 = vmatprep.subr.bf16.mxu0 %v3019_v35  ;;  %v130_v25 = vsub.s32 3, %v3640_v20  ;;  %v119_v26 = vrot.slane %v114_v23, %v118_v21 }
  0x7d   :  { %v370_v32 = vld [vmem:[#allocation8 + $0x320] sm:$0xff]  ;;  %v123_v28 = vrot.slane %v114_v23, %v122_v24 }
  0x7e   :  { %v494_v33 = vld [vmem:[#allocation8 + $0x700] sm:$0xff]  ;;  %1909 = vmatprep.subr.bf16.mxu1 %v3147_v36  ;;  %v3011_v43 = vcombine.high %v366_v31, %v370_v32  ;;  %v3010_v45 = vcombine.low %v366_v31, %v370_v32  ;;  %v131_v29 = vrot.slane %v114_v23, %v130_v25  ;;  %v419_v23 = vld [vmem:[#allocation8 + $0x4a8] sm:$0xff] }
  0x7f   :  { %v498_v34 = vld [vmem:[#allocation8 + $0x720] sm:$0xff]  ;;  %1869 = vmatpush2.bf16.msra.mxu0 %v3018_v37 }
  0x80   :  { %v358_v39 = vld [vmem:[#allocation8 + $0x2c0] sm:$0xff]  ;;  %v3139_v44 = vcombine.high %v494_v33, %v498_v34  ;;  %1910 = vmatpush2.bf16.msra.mxu1 %v3146_v38  ;;  %v3138_v46 = vcombine.low %v494_v33, %v498_v34  ;;  %1870 = vmatprep.subr.bf16.mxu0 %v3011_v43 }
  0x81   :  { %v362_v40 = vld [vmem:[#allocation8 + $0x2e0] sm:$0xff] }
  0x82   :  { %v486_v41 = vld [vmem:[#allocation8 + $0x6c0] sm:$0xff]  ;;  %1911 = vmatprep.subr.bf16.mxu1 %v3139_v44  ;;  %v3003_v51 = vcombine.high %v358_v39, %v362_v40  ;;  %v3002_v53 = vcombine.low %v358_v39, %v362_v40  ;;  %v319_v44 = vld [vmem:[#allocation8 + $0x188] sm:$0xff] }
  0x83   :  { %v490_v42 = vld [vmem:[#allocation8 + $0x6e0] sm:$0xff]  ;;  %1871 = vmatpush2.bf16.msra.mxu0 %v3010_v45 }
  0x84   :  { %v350_v47 = vld [vmem:[#allocation8 + $0x280] sm:$0xff]  ;;  %v3131_v52 = vcombine.high %v486_v41, %v490_v42  ;;  %1912 = vmatpush2.bf16.msra.mxu1 %v3138_v46  ;;  %v3130_v54 = vcombine.low %v486_v41, %v490_v42  ;;  %1872 = vmatprep.subr.bf16.mxu0 %v3003_v51 }
  0x85   :  { %v354_v48 = vld [vmem:[#allocation8 + $0x2a0] sm:$0xff] }
  0x86   :  { %v478_v49 = vld [vmem:[#allocation8 + $0x680] sm:$0xff]  ;;  %1913 = vmatprep.subr.bf16.mxu1 %v3131_v52  ;;  %v2995_v55 = vcombine.high %v350_v47, %v354_v48  ;;  %v2994_v57 = vcombine.low %v350_v47, %v354_v48  ;;  %v323_v48 = vld [vmem:[#allocation8 + $0x1a8] sm:$0xff] }
  0x87   :  { %v482_v50 = vld [vmem:[#allocation8 + $0x6a0] sm:$0xff]  ;;  %1873 = vmatpush2.bf16.msra.mxu0 %v3002_v53 }
  0x88   :  { %v3123_v56 = vcombine.high %v478_v49, %v482_v50  ;;  %1914 = vmatpush2.bf16.msra.mxu1 %v3130_v54  ;;  %v3122_v58 = vcombine.low %v478_v49, %v482_v50  ;;  %1874 = vmatprep.subr.bf16.mxu0 %v2995_v55  ;;  %v342_v59 = vld [vmem:[#allocation8 + $0x240] sm:$0xff]  ;;  %v447_v49 = vld [vmem:[#allocation8 + $0x588] sm:$0xff]  ;;  %v2965_v55 = vcombine.high %v319_v44, %v323_v48 }
  0x89   :  { %v346_v60 = vld [vmem:[#allocation8 + $0x260] sm:$0xff]  ;;  %v451_v50 = vld [vmem:[#allocation8 + $0x5a8] sm:$0xff] }
  0x8a   :  { %1915 = vmatprep.subr.bf16.mxu1 %v3123_v56  ;;  %v470_v61 = vld [vmem:[#allocation8 + $0x640] sm:$0xff]  ;;  %v2987_v62 = vcombine.high %v342_v59, %v346_v60  ;;  %v2986_v0 = vcombine.low %v342_v59, %v346_v60  ;;  %v311_v54 = vld [vmem:[#allocation8 + $0x148] sm:$0xff]  ;;  %v3093_v56 = vcombine.high %v447_v49, %v451_v50  ;;  %v2964_v60 = vcombine.low %v319_v44, %v323_v48 }
  0x8b   :  { %1875 = vmatpush2.bf16.msra.mxu0 %v2994_v57  ;;  %v474_v63 = vld [vmem:[#allocation8 + $0x660] sm:$0xff]  ;;  %v315_v57 = vld [vmem:[#allocation8 + $0x168] sm:$0xff] }
  0x8c   :  { %1916 = vmatpush2.bf16.msra.mxu1 %v3122_v58  ;;  %v3114_v1 = vcombine.low %v470_v61, %v474_v63  ;;  %v3115_v2 = vcombine.high %v470_v61, %v474_v63  ;;  %1876 = vmatprep.subr.bf16.mxu0 %v2987_v62  ;;  %v334_v3 = vld [vmem:[#allocation8 + $0x200] sm:$0xff]  ;;  %v439_v58 = vld [vmem:[#allocation8 + $0x548] sm:$0xff]  ;;  %v3092_v61 = vcombine.low %v447_v49, %v451_v50 }
  0x8d   :  { %v338_v4 = vld [vmem:[#allocation8 + $0x220] sm:$0xff]  ;;  %v443_v59 = vld [vmem:[#allocation8 + $0x568] sm:$0xff]  ;;  %v2957_v62 = vcombine.high %v311_v54, %v315_v57 }
  0x8e   :  { %1917 = vmatprep.subr.bf16.mxu1 %v3115_v2  ;;  %v462_v5 = vld [vmem:[#allocation8 + $0x600] sm:$0xff]  ;;  %v2979_v6 = vcombine.high %v334_v3, %v338_v4  ;;  %v2978_v8 = vcombine.low %v334_v3, %v338_v4  ;;  %v3085_v63 = vcombine.high %v439_v58, %v443_v59  ;;  %v431_v2 = vld [vmem:[#allocation8 + $0x508] sm:$0xff]  ;;  %v2956_v4 = vcombine.low %v311_v54, %v315_v57 }
  0x8f   :  { %1877 = vmatpush2.bf16.msra.mxu0 %v2986_v0  ;;  %v466_v7 = vld [vmem:[#allocation8 + $0x620] sm:$0xff]  ;;  %v303_v0 = vld [vmem:[#allocation8 + $0x108] sm:$0xff] }
  0x90   :  { %1918 = vmatpush2.bf16.msra.mxu1 %v3114_v1  ;;  %v3106_v9 = vcombine.low %v462_v5, %v466_v7  ;;  %v3107_v10 = vcombine.high %v462_v5, %v466_v7  ;;  %1878 = vmatprep.subr.bf16.mxu0 %v2979_v6  ;;  %v307_v1 = vld [vmem:[#allocation8 + $0x128] sm:$0xff]  ;;  %v3084_v5 = vcombine.low %v439_v58, %v443_v59 }
  0x91   :  { %v435_v3 = vld [vmem:[#allocation8 + $0x528] sm:$0xff]  ;;  %v2949_v6 = vcombine.high %v303_v0, %v307_v1  ;;  %v2948_v12 = vcombine.low %v303_v0, %v307_v1 }
  0x92   :  { %1919 = vmatprep.subr.bf16.mxu1 %v3107_v10  ;;  %v3077_v7 = vcombine.high %v431_v2, %v435_v3  ;;  %v423_v10 = vld [vmem:[#allocation8 + $0x4c8] sm:$0xff]  ;;  %v3076_v13 = vcombine.low %v431_v2, %v435_v3 }
  0x93   :  { %1879 = vmatpush2.bf16.msra.mxu0 %v2978_v8  ;;  %v295_v8 = vld [vmem:[#allocation8 + $0xc8] sm:$0xff]  ;;  %v3069_v15 = vcombine.high %v423_v10, %v427_v11 }
  0x94   :  { %1920 = vmatpush2.bf16.msra.mxu1 %v3106_v9  ;;  %1930 = vmatprep.subr.bf16.mxu0 %v2973_v14  ;;  %v299_v9 = vld [vmem:[#allocation8 + $0xe8] sm:$0xff] }
  0x95   :  { %1971 = vmatprep.subr.bf16.mxu1 %v3101_v18  ;;  %v2941_v14 = vcombine.high %v295_v8, %v299_v9  ;;  %v415_v18 = vld [vmem:[#allocation8 + $0x488] sm:$0xff] }
  0x96   :  { %v395_v48 = vld [vmem:[#allocation8 + $0x3e8] sm:$0xff] }
  0x97   :  { %v519_v49 = vld [vmem:[#allocation8 + $0x7c8] sm:$0xff] }
  0x98   :  { %v523_v50 = vld [vmem:[#allocation8 + $0x7e8] sm:$0xff] }
  0x99   :  { %v3165_v57 = vcombine.high %v519_v49, %v523_v50  ;;  %v383_v58 = vld [vmem:[#allocation8 + $0x388] sm:$0xff] }
  0x9a   :  { %v387_v59 = vld [vmem:[#allocation8 + $0x3a8] sm:$0xff] }
  0x9b   :  { %v3029_v0 = vcombine.high %v383_v58, %v387_v59  ;;  %v375_v2 = vld [vmem:[#allocation8 + $0x348] sm:$0xff] }
  0x9c   :  { %v379_v3 = vld [vmem:[#allocation8 + $0x368] sm:$0xff] }
 0x116   :  { %v214_v30 = vpop.f32.mrf.mxu0 }
 0x117   :  { %v255_v31 = vpop.f32.mrf.mxu1  ;;  %v215_v32 = vadd.f32 %v214_v30, %v119_v26  ;;  %v2940_v26 = vcombine.low %v295_v8, %v299_v9  ;;  %v279_v30 = vld [vmem:[#allocation8 + $0x48] sm:$0xff]  ;;  %v3021_v8 = vcombine.high %v375_v2, %v379_v3 }
 0x118   :  { %v256_v33 = vadd.f32 %v255_v31, %v127_v27  ;;  %v216_v34 = vpop.f32.mrf.mxu0  ;;  %v3068_v27 = vcombine.low %v423_v10, %v427_v11  ;;  %v283_v31 = vld [vmem:[#allocation8 + $0x68] sm:$0xff] }
 0x119   :  { %v257_v35 = vpop.f32.mrf.mxu1  ;;  %v217_v37 = vadd.f32 %v216_v34, %v123_v28  ;;  %v262_v39 = vmax.f32 %v215_v32, 0.0  ;;  %v407_v32 = vld [vmem:[#allocation8 + $0x448] sm:$0xff] }
 0x11a   :  { %v264_v36 = vmax.f32 %v256_v33, 0.0  ;;  %v258_v38 = vadd.f32 %v257_v35, %v131_v29  ;;  %v218_v40 = vpop.f32.mrf.mxu0  ;;  %v3061_v29 = vcombine.high %v415_v18, %v419_v23  ;;  %v411_v33 = vld [vmem:[#allocation8 + $0x468] sm:$0xff]  ;;  %v3060_v35 = vcombine.low %v415_v18, %v419_v23 }
 0x11b   :  { %v259_v41 = vpop.f32.mrf.mxu1  ;;  %v263_v42 = vmax.f32 %v217_v37, 0.0  ;;  %v3660_v53 = vpack.c.bf16 %v262_v39, %v262_v39  ;;  %v3053_v37 = vcombine.high %v407_v32, %v411_v33  ;;  %v275_v39 = vld [vmem:[#allocation8 + $0x28] sm:$0xff] }
 0x11c   :  { %v265_v43 = vmax.f32 %v258_v38, 0.0  ;;  %v3654_v45 = vpack.c.bf16 %v264_v36, %v264_v36  ;;  %v219_v46 = vpop.f32.mrf.mxu0  ;;  %v2925_v36 = vcombine.high %v279_v30, %v283_v31  ;;  %v271_v38 = vld [vmem:[#allocation8 + $0x8] sm:$0xff] }
 0x11d   :  { %v260_v47 = vpop.f32.mrf.mxu1  ;;  %v3656_v51 = vpack.c.bf16 %v263_v42, %v263_v42  ;;  %v399_v40 = vld [vmem:[#allocation8 + $0x408] sm:$0xff]  ;;  %v2924_v42 = vcombine.low %v279_v30, %v283_v31  ;;  %v2917_v44 = vcombine.high %v271_v38, %v275_v39  ;;  %v2916_v54 = vcombine.low %v271_v38, %v275_v39 }
 0x11e   :  { %v3658_v52 = vpack.c.bf16 %v265_v43, %v265_v43  ;;  %v403_v41 = vld [vmem:[#allocation8 + $0x428] sm:$0xff]  ;;  %v3052_v43 = vcombine.low %v407_v32, %v411_v33 }
 0x11f   :  { %1880 = vmatprep.mubr.bf16.mxu0 %v3656_v51  ;;  %v3045_v46 = vcombine.high %v399_v40, %v403_v41  ;;  %v391_v47 = vld [vmem:[#allocation8 + $0x3c8] sm:$0xff] }
 0x120   :  { %1921 = vmatprep.mubr.bf16.mxu1 %v3658_v52  ;;  %1881 = vmatmul.mubr.bf16.vlgmr.msra.gmra.mxu0 %v3660_v53  ;;  %v367_v10 = vld [vmem:[#allocation8 + $0x308] sm:$0xff] }
 0x121   :  { %1922 = vmatmul.mubr.bf16.vlgmr.msra.gmra.mxu1 %v3654_v45  ;;  %1931 = vmatpush1.bf16.msra.mxu0 %v2972_v16  ;;  %v287_v16 = vld [vmem:[#allocation8 + $0x88] sm:$0xff] }
 0x122   :  { %1972 = vmatpush1.bf16.msra.mxu1 %v3100_v17  ;;  %1962 = vmatprep.mubr.bf16.mxu0 %v3656_v51  ;;  %v291_v17 = vld [vmem:[#allocation8 + $0xa8] sm:$0xff] }
 0x123   :  { %2003 = vmatprep.mubr.bf16.mxu1 %v3658_v52  ;;  %1932 = vmatprep.subr.bf16.mxu0 %v2965_v55  ;;  %v2933_v28 = vcombine.high %v287_v16, %v291_v17  ;;  %v2932_v34 = vcombine.low %v287_v16, %v291_v17  ;;  %v3044_v55 = vcombine.low %v399_v40, %v403_v41  ;;  %v371_v11 = vld [vmem:[#allocation8 + $0x328] sm:$0xff] }
 0x124   :  { %1973 = vmatprep.subr.bf16.mxu1 %v3093_v56  ;;  %v3037_v56 = vcombine.high %v391_v47, %v395_v48  ;;  %v3013_v16 = vcombine.high %v367_v10, %v371_v11  ;;  %v359_v18 = vld [vmem:[#allocation8 + $0x2c8] sm:$0xff] }
 0x125   :  { %1933 = vmatpush1.bf16.msra.mxu0 %v2964_v60  ;;  %v511_v60 = vld [vmem:[#allocation8 + $0x788] sm:$0xff] }
 0x126   :  { %1974 = vmatpush1.bf16.msra.mxu1 %v3092_v61  ;;  %1934 = vmatprep.subr.bf16.mxu0 %v2957_v62  ;;  %v515_v61 = vld [vmem:[#allocation8 + $0x7a8] sm:$0xff]  ;;  %v3036_v62 = vcombine.low %v391_v47, %v395_v48 }
 0x127   :  { %1975 = vmatprep.subr.bf16.mxu1 %v3085_v63  ;;  %v3164_v63 = vcombine.low %v519_v49, %v523_v50  ;;  %v3157_v1 = vcombine.high %v511_v60, %v515_v61  ;;  %v363_v23 = vld [vmem:[#allocation8 + $0x2e8] sm:$0xff] }
 0x128   :  { %v3005_v30 = vcombine.high %v359_v18, %v363_v23  ;;  %v351_v32 = vld [vmem:[#allocation8 + $0x288] sm:$0xff] }
 0x129   :  { %1935 = vmatpush1.bf16.msra.mxu0 %v2956_v4  ;;  %v503_v4 = vld [vmem:[#allocation8 + $0x748] sm:$0xff] }
 0x12a   :  { %1976 = vmatpush1.bf16.msra.mxu1 %v3084_v5  ;;  %1936 = vmatprep.subr.bf16.mxu0 %v2949_v6  ;;  %v507_v5 = vld [vmem:[#allocation8 + $0x768] sm:$0xff]  ;;  %v3028_v6 = vcombine.low %v383_v58, %v387_v59 }
 0x12b   :  { %1977 = vmatprep.subr.bf16.mxu1 %v3077_v7  ;;  %v3156_v7 = vcombine.low %v511_v60, %v515_v61  ;;  %v3149_v9 = vcombine.high %v503_v4, %v507_v5  ;;  %v355_v33 = vld [vmem:[#allocation8 + $0x2a8] sm:$0xff]  ;;  %v328_v60 = vld [vmem:[#allocation8 + $0x1d0] sm:$0xff] }
 0x12c   :  { %v2997_v38 = vcombine.high %v351_v32, %v355_v33  ;;  %v343_v40 = vld [vmem:[#allocation8 + $0x248] sm:$0xff]  ;;  %v332_v61 = vld [vmem:[#allocation8 + $0x1f0] sm:$0xff] }
 0x12d   :  { %1937 = vmatpush1.bf16.msra.mxu0 %v2948_v12  ;;  %v495_v12 = vld [vmem:[#allocation8 + $0x708] sm:$0xff] }
 0x12e   :  { %1978 = vmatpush1.bf16.msra.mxu1 %v3076_v13  ;;  %1938 = vmatprep.subr.bf16.mxu0 %v2941_v14  ;;  %v499_v13 = vld [vmem:[#allocation8 + $0x728] sm:$0xff]  ;;  %v3020_v14 = vcombine.low %v375_v2, %v379_v3  ;;  %v2975_v2 = vcombine.high %v328_v60, %v332_v61 }
 0x12f   :  { %1979 = vmatprep.subr.bf16.mxu1 %v3069_v15  ;;  %v3148_v15 = vcombine.low %v503_v4, %v507_v5  ;;  %v3141_v17 = vcombine.high %v495_v12, %v499_v13  ;;  %v347_v41 = vld [vmem:[#allocation8 + $0x268] sm:$0xff]  ;;  %v320_v4 = vld [vmem:[#allocation8 + $0x190] sm:$0xff] }
 0x130   :  { %v2989_v47 = vcombine.high %v343_v40, %v347_v41  ;;  %v335_v49 = vld [vmem:[#allocation8 + $0x208] sm:$0xff]  ;;  %v324_v5 = vld [vmem:[#allocation8 + $0x1b0] sm:$0xff] }
 0x131   :  { %1939 = vmatpush1.bf16.msra.mxu0 %v2940_v26  ;;  %v487_v26 = vld [vmem:[#allocation8 + $0x6c8] sm:$0xff] }
 0x132   :  { %1980 = vmatpush1.bf16.msra.mxu1 %v3068_v27  ;;  %1940 = vmatprep.subr.bf16.mxu0 %v2933_v28  ;;  %v491_v27 = vld [vmem:[#allocation8 + $0x6e8] sm:$0xff]  ;;  %v3012_v28 = vcombine.low %v367_v10, %v371_v11  ;;  %v2967_v10 = vcombine.high %v320_v4, %v324_v5 }
 0x133   :  { %1981 = vmatprep.subr.bf16.mxu1 %v3061_v29  ;;  %v3140_v29 = vcombine.low %v495_v12, %v499_v13  ;;  %v3133_v31 = vcombine.high %v487_v26, %v491_v27  ;;  %v339_v50 = vld [vmem:[#allocation8 + $0x228] sm:$0xff]  ;;  %v312_v12 = vld [vmem:[#allocation8 + $0x150] sm:$0xff] }
 0x134   :  { %v2981_v58 = vcombine.high %v335_v49, %v339_v50  ;;  %v316_v13 = vld [vmem:[#allocation8 + $0x170] sm:$0xff] }
 0x135   :  { %1941 = vmatpush1.bf16.msra.mxu0 %v2932_v34  ;;  %v479_v34 = vld [vmem:[#allocation8 + $0x688] sm:$0xff] }
 0x136   :  { %1982 = vmatpush1.bf16.msra.mxu1 %v3060_v35  ;;  %1942 = vmatprep.subr.bf16.mxu0 %v2925_v36  ;;  %v483_v35 = vld [vmem:[#allocation8 + $0x6a8] sm:$0xff]  ;;  %v3004_v36 = vcombine.low %v359_v18, %v363_v23  ;;  %v2959_v18 = vcombine.high %v312_v12, %v316_v13 }
 0x137   :  { %1983 = vmatprep.subr.bf16.mxu1 %v3053_v37  ;;  %v3132_v37 = vcombine.low %v487_v26, %v491_v27  ;;  %v3125_v39 = vcombine.high %v479_v34, %v483_v35  ;;  %v304_v26 = vld [vmem:[#allocation8 + $0x110] sm:$0xff] }
 0x138   :  { %v308_v27 = vld [vmem:[#allocation8 + $0x130] sm:$0xff] }
 0x139   :  { %1943 = vmatpush1.bf16.msra.mxu0 %v2924_v42  ;;  %v471_v42 = vld [vmem:[#allocation8 + $0x648] sm:$0xff] }
 0x13a   :  { %1984 = vmatpush1.bf16.msra.mxu1 %v3052_v43  ;;  %1944 = vmatprep.subr.bf16.mxu0 %v2917_v44  ;;  %v475_v43 = vld [vmem:[#allocation8 + $0x668] sm:$0xff]  ;;  %v2996_v44 = vcombine.low %v351_v32, %v355_v33  ;;  %v2951_v32 = vcombine.high %v304_v26, %v308_v27 }
 0x13b   :  { %1985 = vmatprep.subr.bf16.mxu1 %v3045_v46  ;;  %v3124_v46 = vcombine.low %v479_v34, %v483_v35  ;;  %v3117_v48 = vcombine.high %v471_v42, %v475_v43  ;;  %v296_v34 = vld [vmem:[#allocation8 + $0xd0] sm:$0xff] }
 0x13c   :  { %v300_v35 = vld [vmem:[#allocation8 + $0xf0] sm:$0xff] }
 0x13d   :  { %1945 = vmatpush1.bf16.msra.mxu0 %v2916_v54  ;;  %v463_v54 = vld [vmem:[#allocation8 + $0x608] sm:$0xff] }
 0x13e   :  { %1986 = vmatpush1.bf16.msra.mxu1 %v3044_v55  ;;  %1946 = vmatprep.subr.bf16.mxu0 %v3037_v56  ;;  %v467_v55 = vld [vmem:[#allocation8 + $0x628] sm:$0xff]  ;;  %v2988_v56 = vcombine.low %v343_v40, %v347_v41  ;;  %v2943_v40 = vcombine.high %v296_v34, %v300_v35 }
 0x13f   :  { %1987 = vmatprep.subr.bf16.mxu1 %v3165_v57  ;;  %v3116_v57 = vcombine.low %v471_v42, %v475_v43  ;;  %v3109_v59 = vcombine.high %v463_v54, %v467_v55  ;;  %v288_v42 = vld [vmem:[#allocation8 + $0x90] sm:$0xff] }
 0x140   :  { %v292_v43 = vld [vmem:[#allocation8 + $0xb0] sm:$0xff] }
 0x141   :  { %1947 = vmatpush2.bf16.msra.mxu0 %v3036_v62  ;;  %v456_v62 = vld [vmem:[#allocation8 + $0x5d0] sm:$0xff] }
 0x142   :  { %1988 = vmatpush2.bf16.msra.mxu1 %v3164_v63  ;;  %1948 = vmatprep.subr.bf16.mxu0 %v3029_v0  ;;  %v460_v63 = vld [vmem:[#allocation8 + $0x5f0] sm:$0xff]  ;;  %v2980_v0 = vcombine.low %v335_v49, %v339_v50  ;;  %v2935_v49 = vcombine.high %v288_v42, %v292_v43 }
 0x143   :  { %1989 = vmatprep.subr.bf16.mxu1 %v3157_v1  ;;  %v3108_v1 = vcombine.low %v463_v54, %v467_v55  ;;  %v3103_v3 = vcombine.high %v456_v62, %v460_v63  ;;  %v280_v54 = vld [vmem:[#allocation8 + $0x50] sm:$0xff] }
 0x144   :  { %v284_v55 = vld [vmem:[#allocation8 + $0x70] sm:$0xff] }
 0x145   :  { %1949 = vmatpush2.bf16.msra.mxu0 %v3028_v6  ;;  %v448_v6 = vld [vmem:[#allocation8 + $0x590] sm:$0xff] }
 0x146   :  { %1990 = vmatpush2.bf16.msra.mxu1 %v3156_v7  ;;  %1950 = vmatprep.subr.bf16.mxu0 %v3021_v8  ;;  %v452_v7 = vld [vmem:[#allocation8 + $0x5b0] sm:$0xff]  ;;  %v2974_v8 = vcombine.low %v328_v60, %v332_v61  ;;  %v2927_v60 = vcombine.high %v280_v54, %v284_v55 }
 0x147   :  { %1991 = vmatprep.subr.bf16.mxu1 %v3149_v9  ;;  %v3102_v9 = vcombine.low %v456_v62, %v460_v63  ;;  %v3095_v11 = vcombine.high %v448_v6, %v452_v7  ;;  %v272_v62 = vld [vmem:[#allocation8 + $0x10] sm:$0xff] }
 0x148   :  { %v276_v63 = vld [vmem:[#allocation8 + $0x30] sm:$0xff] }
 0x149   :  { %1951 = vmatpush2.bf16.msra.mxu0 %v3020_v14  ;;  %v440_v14 = vld [vmem:[#allocation8 + $0x550] sm:$0xff] }
 0x14a   :  { %1992 = vmatpush2.bf16.msra.mxu1 %v3148_v15  ;;  %1952 = vmatprep.subr.bf16.mxu0 %v3013_v16  ;;  %v444_v15 = vld [vmem:[#allocation8 + $0x570] sm:$0xff]  ;;  %v2966_v16 = vcombine.low %v320_v4, %v324_v5  ;;  %v2919_v4 = vcombine.high %v272_v62, %v276_v63 }
 0x14b   :  { %1993 = vmatprep.subr.bf16.mxu1 %v3141_v17  ;;  %v3094_v17 = vcombine.low %v448_v6, %v452_v7  ;;  %v3087_v23 = vcombine.high %v440_v14, %v444_v15  ;;  %v392_v6 = vld [vmem:[#allocation8 + $0x3d0] sm:$0xff] }
 0x14c   :  { %v396_v7 = vld [vmem:[#allocation8 + $0x3f0] sm:$0xff] }
 0x14d   :  { %1953 = vmatpush2.bf16.msra.mxu0 %v3012_v28  ;;  %v432_v28 = vld [vmem:[#allocation8 + $0x510] sm:$0xff] }
 0x14e   :  { %1994 = vmatpush2.bf16.msra.mxu1 %v3140_v29  ;;  %1954 = vmatprep.subr.bf16.mxu0 %v3005_v30  ;;  %v436_v29 = vld [vmem:[#allocation8 + $0x530] sm:$0xff]  ;;  %v2958_v30 = vcombine.low %v312_v12, %v316_v13  ;;  %v3039_v12 = vcombine.high %v392_v6, %v396_v7 }
 0x14f   :  { %1995 = vmatprep.subr.bf16.mxu1 %v3133_v31  ;;  %v3086_v31 = vcombine.low %v440_v14, %v444_v15  ;;  %v3079_v33 = vcombine.high %v432_v28, %v436_v29  ;;  %v384_v14 = vld [vmem:[#allocation8 + $0x390] sm:$0xff] }
 0x150   :  { %v388_v15 = vld [vmem:[#allocation8 + $0x3b0] sm:$0xff] }
 0x151   :  { %1955 = vmatpush2.bf16.msra.mxu0 %v3004_v36  ;;  %v424_v36 = vld [vmem:[#allocation8 + $0x4d0] sm:$0xff] }
 0x152   :  { %1996 = vmatpush2.bf16.msra.mxu1 %v3132_v37  ;;  %1956 = vmatprep.subr.bf16.mxu0 %v2997_v38  ;;  %v428_v37 = vld [vmem:[#allocation8 + $0x4f0] sm:$0xff]  ;;  %v2950_v38 = vcombine.low %v304_v26, %v308_v27  ;;  %v3031_v26 = vcombine.high %v384_v14, %v388_v15 }
 0x153   :  { %1997 = vmatprep.subr.bf16.mxu1 %v3125_v39  ;;  %v3078_v39 = vcombine.low %v432_v28, %v436_v29  ;;  %v3071_v41 = vcombine.high %v424_v36, %v428_v37  ;;  %v376_v28 = vld [vmem:[#allocation8 + $0x350] sm:$0xff] }
 0x154   :  { %v380_v29 = vld [vmem:[#allocation8 + $0x370] sm:$0xff] }
 0x155   :  { %1957 = vmatpush2.bf16.msra.mxu0 %v2996_v44  ;;  %v416_v44 = vld [vmem:[#allocation8 + $0x490] sm:$0xff] }
 0x156   :  { %1998 = vmatpush2.bf16.msra.mxu1 %v3124_v46  ;;  %1958 = vmatprep.subr.bf16.mxu0 %v2989_v47  ;;  %v420_v46 = vld [vmem:[#allocation8 + $0x4b0] sm:$0xff]  ;;  %v2942_v47 = vcombine.low %v296_v34, %v300_v35  ;;  %v3023_v34 = vcombine.high %v376_v28, %v380_v29 }
 0x157   :  { %1999 = vmatprep.subr.bf16.mxu1 %v3117_v48  ;;  %v3070_v48 = vcombine.low %v424_v36, %v428_v37  ;;  %v3063_v50 = vcombine.high %v416_v44, %v420_v46  ;;  %v368_v36 = vld [vmem:[#allocation8 + $0x310] sm:$0xff] }
 0x158   :  { %v372_v37 = vld [vmem:[#allocation8 + $0x330] sm:$0xff] }
 0x159   :  { %1959 = vmatpush2.bf16.msra.mxu0 %v2988_v56  ;;  %v408_v56 = vld [vmem:[#allocation8 + $0x450] sm:$0xff] }
 0x15a   :  { %2000 = vmatpush2.bf16.msra.mxu1 %v3116_v57  ;;  %1960 = vmatprep.subr.bf16.mxu0 %v2981_v58  ;;  %v412_v57 = vld [vmem:[#allocation8 + $0x470] sm:$0xff]  ;;  %v2934_v58 = vcombine.low %v288_v42, %v292_v43  ;;  %v3015_v42 = vcombine.high %v368_v36, %v372_v37 }
 0x15b   :  { %2001 = vmatprep.subr.bf16.mxu1 %v3109_v59  ;;  %v3062_v59 = vcombine.low %v416_v44, %v420_v46  ;;  %v3055_v61 = vcombine.high %v408_v56, %v412_v57  ;;  %v360_v44 = vld [vmem:[#allocation8 + $0x2d0] sm:$0xff] }
 0x15c   :  { %v364_v46 = vld [vmem:[#allocation8 + $0x2f0] sm:$0xff] }
 0x15d   :  { %1961 = vmatpush2.bf16.msra.mxu0 %v2980_v0  ;;  %v400_v0 = vld [vmem:[#allocation8 + $0x410] sm:$0xff] }
 0x15e   :  { %2002 = vmatpush2.bf16.msra.mxu1 %v3108_v1  ;;  %2012 = vmatprep.subr.bf16.mxu0 %v2975_v2  ;;  %v404_v1 = vld [vmem:[#allocation8 + $0x430] sm:$0xff]  ;;  %v2926_v2 = vcombine.low %v280_v54, %v284_v55  ;;  %v3007_v54 = vcombine.high %v360_v44, %v364_v46 }
 0x15f   :  { %2053 = vmatprep.subr.bf16.mxu1 %v3103_v3  ;;  %v3054_v3 = vcombine.low %v408_v56, %v412_v57  ;;  %v3047_v5 = vcombine.high %v400_v0, %v404_v1  ;;  %v352_v56 = vld [vmem:[#allocation8 + $0x290] sm:$0xff] }
 0x160   :  { %1963 = vmatmul.mubr.bf16.vlgmr.msra.gmra.mxu0 %v3660_v53  ;;  %v356_v57 = vld [vmem:[#allocation8 + $0x2b0] sm:$0xff] }
 0x161   :  { %2004 = vmatmul.mubr.bf16.vlgmr.msra.gmra.mxu1 %v3654_v45  ;;  %2013 = vmatpush1.bf16.msra.mxu0 %v2974_v8  ;;  %v520_v8 = vld [vmem:[#allocation8 + $0x7d0] sm:$0xff] }
 0x162   :  { %2044 = vmatprep.mubr.bf16.mxu0 %v3656_v51  ;;  %2054 = vmatpush1.bf16.msra.mxu1 %v3102_v9  ;;  %v524_v9 = vld [vmem:[#allocation8 + $0x7f0] sm:$0xff] }
 0x163   :  { %2085 = vmatprep.mubr.bf16.mxu1 %v3658_v52  ;;  %2014 = vmatprep.subr.bf16.mxu0 %v2967_v10  ;;  %v2918_v10 = vcombine.low %v272_v62, %v276_v63  ;;  %v3167_v13 = vcombine.high %v520_v8, %v524_v9  ;;  %v2999_v62 = vcombine.high %v352_v56, %v356_v57 }
 0x164   :  { %2055 = vmatprep.subr.bf16.mxu1 %v3095_v11  ;;  %v3046_v11 = vcombine.low %v400_v0, %v404_v1  ;;  %v344_v0 = vld [vmem:[#allocation8 + $0x250] sm:$0xff] }
 0x165   :  { %2015 = vmatpush1.bf16.msra.mxu0 %v2966_v16  ;;  %v512_v16 = vld [vmem:[#allocation8 + $0x790] sm:$0xff] }
 0x166   :  { %2056 = vmatpush1.bf16.msra.mxu1 %v3094_v17  ;;  %2016 = vmatprep.subr.bf16.mxu0 %v2959_v18  ;;  %v516_v17 = vld [vmem:[#allocation8 + $0x7b0] sm:$0xff]  ;;  %v3038_v18 = vcombine.low %v392_v6, %v396_v7 }
 0x167   :  { %2057 = vmatprep.subr.bf16.mxu1 %v3087_v23  ;;  %v3166_v23 = vcombine.low %v520_v8, %v524_v9  ;;  %v3159_v27 = vcombine.high %v512_v16, %v516_v17  ;;  %v348_v1 = vld [vmem:[#allocation8 + $0x270] sm:$0xff] }
 0x168   :  { %v2991_v6 = vcombine.high %v344_v0, %v348_v1  ;;  %v336_v8 = vld [vmem:[#allocation8 + $0x210] sm:$0xff] }
 0x169   :  { %2017 = vmatpush1.bf16.msra.mxu0 %v2958_v30  ;;  %v504_v30 = vld [vmem:[#allocation8 + $0x750] sm:$0xff] }
 0x16a   :  { %2058 = vmatpush1.bf16.msra.mxu1 %v3086_v31  ;;  %2018 = vmatprep.subr.bf16.mxu0 %v2951_v32  ;;  %v508_v31 = vld [vmem:[#allocation8 + $0x770] sm:$0xff]  ;;  %v3030_v32 = vcombine.low %v384_v14, %v388_v15 }
 0x16b   :  { %2059 = vmatprep.subr.bf16.mxu1 %v3079_v33  ;;  %v3158_v33 = vcombine.low %v512_v16, %v516_v17  ;;  %v3151_v35 = vcombine.high %v504_v30, %v508_v31  ;;  %v340_v9 = vld [vmem:[#allocation8 + $0x230] sm:$0xff]  ;;  %v329_v16 = vld [vmem:[#allocation8 + $0x1d8] sm:$0xff] }
 0x16c   :  { %v2983_v14 = vcombine.high %v336_v8, %v340_v9  ;;  %v333_v17 = vld [vmem:[#allocation8 + $0x1f8] sm:$0xff] }
 0x16d   :  { %2019 = vmatpush1.bf16.msra.mxu0 %v2950_v38  ;;  %v496_v38 = vld [vmem:[#allocation8 + $0x710] sm:$0xff] }
 0x16e   :  { %2060 = vmatpush1.bf16.msra.mxu1 %v3078_v39  ;;  %2020 = vmatprep.subr.bf16.mxu0 %v2943_v40  ;;  %v500_v39 = vld [vmem:[#allocation8 + $0x730] sm:$0xff]  ;;  %v3022_v40 = vcombine.low %v376_v28, %v380_v29  ;;  %v2977_v28 = vcombine.high %v329_v16, %v333_v17 }
 0x16f   :  { %2061 = vmatprep.subr.bf16.mxu1 %v3071_v41  ;;  %v3150_v41 = vcombine.low %v504_v30, %v508_v31  ;;  %v3143_v43 = vcombine.high %v496_v38, %v500_v39  ;;  %v321_v30 = vld [vmem:[#allocation8 + $0x198] sm:$0xff] }
 0x170   :  { %v325_v31 = vld [vmem:[#allocation8 + $0x1b8] sm:$0xff] }
 0x171   :  { %2021 = vmatpush1.bf16.msra.mxu0 %v2942_v47  ;;  %v488_v47 = vld [vmem:[#allocation8 + $0x6d0] sm:$0xff] }
 0x172   :  { %2062 = vmatpush1.bf16.msra.mxu1 %v3070_v48  ;;  %2022 = vmatprep.subr.bf16.mxu0 %v2935_v49  ;;  %v492_v48 = vld [vmem:[#allocation8 + $0x6f0] sm:$0xff]  ;;  %v3014_v49 = vcombine.low %v368_v36, %v372_v37  ;;  %v2969_v36 = vcombine.high %v321_v30, %v325_v31  ;;  %v313_v37 = vld [vmem:[#allocation8 + $0x158] sm:$0xff] }
 0x173   :  { %2063 = vmatprep.subr.bf16.mxu1 %v3063_v50  ;;  %v3142_v50 = vcombine.low %v496_v38, %v500_v39  ;;  %v3135_v55 = vcombine.high %v488_v47, %v492_v48  ;;  %v317_v38 = vld [vmem:[#allocation8 + $0x178] sm:$0xff] }
 0x175   :  { %2023 = vmatpush1.bf16.msra.mxu0 %v2934_v58  ;;  %v480_v58 = vld [vmem:[#allocation8 + $0x690] sm:$0xff] }
 0x176   :  { %2064 = vmatpush1.bf16.msra.mxu1 %v3062_v59  ;;  %2024 = vmatprep.subr.bf16.mxu0 %v2927_v60  ;;  %v484_v59 = vld [vmem:[#allocation8 + $0x6b0] sm:$0xff]  ;;  %v3006_v60 = vcombine.low %v360_v44, %v364_v46  ;;  %v2961_v44 = vcombine.high %v313_v37, %v317_v38 }
 0x177   :  { %2065 = vmatprep.subr.bf16.mxu1 %v3055_v61  ;;  %v3134_v61 = vcombine.low %v488_v47, %v492_v48  ;;  %v3127_v63 = vcombine.high %v480_v58, %v484_v59  ;;  %v305_v47 = vld [vmem:[#allocation8 + $0x118] sm:$0xff] }
 0x178   :  { %v309_v48 = vld [vmem:[#allocation8 + $0x138] sm:$0xff] }
 0x179   :  { %2025 = vmatpush1.bf16.msra.mxu0 %v2926_v2  ;;  %v472_v2 = vld [vmem:[#allocation8 + $0x650] sm:$0xff] }
 0x17a   :  { %2066 = vmatpush1.bf16.msra.mxu1 %v3054_v3  ;;  %2026 = vmatprep.subr.bf16.mxu0 %v2919_v4  ;;  %v476_v3 = vld [vmem:[#allocation8 + $0x670] sm:$0xff]  ;;  %v2998_v4 = vcombine.low %v352_v56, %v356_v57  ;;  %v2953_v56 = vcombine.high %v305_v47, %v309_v48  ;;  %v297_v57 = vld [vmem:[#allocation8 + $0xd8] sm:$0xff] }
 0x17b   :  { %2067 = vmatprep.subr.bf16.mxu1 %v3047_v5  ;;  %v3126_v5 = vcombine.low %v480_v58, %v484_v59  ;;  %v3119_v7 = vcombine.high %v472_v2, %v476_v3  ;;  %v301_v58 = vld [vmem:[#allocation8 + $0xf8] sm:$0xff] }
 0x17c   :  { %v425_v59 = vld [vmem:[#allocation8 + $0x4d8] sm:$0xff] }
 0x17d   :  { %2027 = vmatpush1.bf16.msra.mxu0 %v2918_v10  ;;  %v464_v10 = vld [vmem:[#allocation8 + $0x610] sm:$0xff] }
 0x17e   :  { %2068 = vmatpush1.bf16.msra.mxu1 %v3046_v11  ;;  %2028 = vmatprep.subr.bf16.mxu0 %v3039_v12  ;;  %v468_v11 = vld [vmem:[#allocation8 + $0x630] sm:$0xff]  ;;  %v2990_v12 = vcombine.low %v344_v0, %v348_v1  ;;  %v289_v0 = vld [vmem:[#allocation8 + $0x98] sm:$0xff] }
 0x17f   :  { %2069 = vmatprep.subr.bf16.mxu1 %v3167_v13  ;;  %v3118_v13 = vcombine.low %v472_v2, %v476_v3  ;;  %v3111_v15 = vcombine.high %v464_v10, %v468_v11  ;;  %v293_v1 = vld [vmem:[#allocation8 + $0xb8] sm:$0xff] }
 0x180   :  { %v417_v2 = vld [vmem:[#allocation8 + $0x498] sm:$0xff] }
 0x181   :  { %2029 = vmatpush2.bf16.msra.mxu0 %v3038_v18  ;;  %v457_v18 = vld [vmem:[#allocation8 + $0x5d8] sm:$0xff] }
 0x182   :  { %2070 = vmatpush2.bf16.msra.mxu1 %v3166_v23  ;;  %2030 = vmatprep.subr.bf16.mxu0 %v3031_v26  ;;  %v461_v23 = vld [vmem:[#allocation8 + $0x5f8] sm:$0xff]  ;;  %v2982_v26 = vcombine.low %v336_v8, %v340_v9 }
 0x183   :  { %2071 = vmatprep.subr.bf16.mxu1 %v3159_v27  ;;  %v3110_v27 = vcombine.low %v464_v10, %v468_v11  ;;  %v3105_v29 = vcombine.high %v457_v18, %v461_v23  ;;  %v421_v3 = vld [vmem:[#allocation8 + $0x4b8] sm:$0xff] }
 0x184   :  { %v281_v8 = vld [vmem:[#allocation8 + $0x58] sm:$0xff] }
 0x185   :  { %2031 = vmatpush2.bf16.msra.mxu0 %v3030_v32  ;;  %v2976_v32 = vcombine.low %v329_v16, %v333_v17  ;;  %v285_v9 = vld [vmem:[#allocation8 + $0x78] sm:$0xff] }
 0x186   :  { %2072 = vmatpush2.bf16.msra.mxu1 %v3158_v33  ;;  %2032 = vmatprep.subr.bf16.mxu0 %v3023_v34  ;;  %v449_v33 = vld [vmem:[#allocation8 + $0x598] sm:$0xff] }
 0x187   :  { %2073 = vmatprep.subr.bf16.mxu1 %v3151_v35  ;;  %v453_v34 = vld [vmem:[#allocation8 + $0x5b8] sm:$0xff]  ;;  %v3104_v35 = vcombine.low %v457_v18, %v461_v23 }
 0x188   :  { %v3097_v39 = vcombine.high %v449_v33, %v453_v34  ;;  %v409_v10 = vld [vmem:[#allocation8 + $0x458] sm:$0xff] }
 0x189   :  { %2033 = vmatpush2.bf16.msra.mxu0 %v3022_v40  ;;  %v441_v40 = vld [vmem:[#allocation8 + $0x558] sm:$0xff] }
 0x18a   :  { %2074 = vmatpush2.bf16.msra.mxu1 %v3150_v41  ;;  %2034 = vmatprep.subr.bf16.mxu0 %v3015_v42  ;;  %v445_v41 = vld [vmem:[#allocation8 + $0x578] sm:$0xff]  ;;  %v2968_v42 = vcombine.low %v321_v30, %v325_v31 }
 0x18b   :  { %2075 = vmatprep.subr.bf16.mxu1 %v3143_v43  ;;  %v3096_v43 = vcombine.low %v449_v33, %v453_v34  ;;  %v3089_v46 = vcombine.high %v441_v40, %v445_v41  ;;  %v413_v11 = vld [vmem:[#allocation8 + $0x478] sm:$0xff] }
 0x18c   :  { %v273_v16 = vld [vmem:[#allocation8 + $0x18] sm:$0xff] }
 0x18d   :  { %2035 = vmatpush2.bf16.msra.mxu0 %v3014_v49  ;;  %v433_v49 = vld [vmem:[#allocation8 + $0x518] sm:$0xff] }
 0x18e   :  { %2076 = vmatpush2.bf16.msra.mxu1 %v3142_v50  ;;  %2036 = vmatprep.subr.bf16.mxu0 %v3007_v54  ;;  %v437_v50 = vld [vmem:[#allocation8 + $0x538] sm:$0xff]  ;;  %v2960_v54 = vcombine.low %v313_v37, %v317_v38 }
 0x18f   :  { %2077 = vmatprep.subr.bf16.mxu1 %v3135_v55  ;;  %v3088_v55 = vcombine.low %v441_v40, %v445_v41  ;;  %v277_v17 = vld [vmem:[#allocation8 + $0x38] sm:$0xff] }
 0x190   :  { %v401_v18 = vld [vmem:[#allocation8 + $0x418] sm:$0xff]  ;;  %v2920_v34 = vcombine.low %v273_v16, %v277_v17 }
 0x191   :  { %2037 = vmatpush2.bf16.msra.mxu0 %v3006_v60  ;;  %v429_v60 = vld [vmem:[#allocation8 + $0x4f8] sm:$0xff] }
 0x192   :  { %2078 = vmatpush2.bf16.msra.mxu1 %v3134_v61  ;;  %2038 = vmatprep.subr.bf16.mxu0 %v2999_v62  ;;  %v3080_v61 = vcombine.low %v433_v49, %v437_v50  ;;  %v2945_v62 = vcombine.high %v297_v57, %v301_v58  ;;  %v405_v23 = vld [vmem:[#allocation8 + $0x438] sm:$0xff] }
 0x193   :  { %2079 = vmatprep.subr.bf16.mxu1 %v3127_v63  ;;  %v3073_v63 = vcombine.high %v425_v59, %v429_v60  ;;  %v393_v30 = vld [vmem:[#allocation8 + $0x3d8] sm:$0xff] }
 0x194   :  { %v397_v31 = vld [vmem:[#allocation8 + $0x3f8] sm:$0xff] }
 0x195   :  { %2039 = vmatpush2.bf16.msra.mxu0 %v2998_v4  ;;  %v2944_v4 = vcombine.low %v297_v57, %v301_v58  ;;  %v525_v33 = vld [vmem:[#allocation8 + $0x7f8] sm:$0xff] }
 0x196   :  { %2080 = vmatpush2.bf16.msra.mxu1 %v3126_v5  ;;  %2040 = vmatprep.subr.bf16.mxu0 %v2991_v6  ;;  %v3072_v5 = vcombine.low %v425_v59, %v429_v60  ;;  %v2937_v6 = vcombine.high %v289_v0, %v293_v1  ;;  %v385_v38 = vld [vmem:[#allocation8 + $0x398] sm:$0xff] }
 0x197   :  { %2081 = vmatprep.subr.bf16.mxu1 %v3119_v7  ;;  %v3065_v7 = vcombine.high %v417_v2, %v421_v3  ;;  %v513_v40 = vld [vmem:[#allocation8 + $0x798] sm:$0xff] }
 0x198   :  { %v517_v41 = vld [vmem:[#allocation8 + $0x7b8] sm:$0xff] }
 0x199   :  { %2041 = vmatpush2.bf16.msra.mxu0 %v2990_v12  ;;  %v2936_v12 = vcombine.low %v289_v0, %v293_v1  ;;  %v369_v57 = vld [vmem:[#allocation8 + $0x318] sm:$0xff] }
 0x19a   :  { %2082 = vmatpush2.bf16.msra.mxu1 %v3118_v13  ;;  %2042 = vmatprep.subr.bf16.mxu0 %v2983_v14  ;;  %v3064_v13 = vcombine.low %v417_v2, %v421_v3  ;;  %v2929_v14 = vcombine.high %v281_v8, %v285_v9  ;;  %v373_v58 = vld [vmem:[#allocation8 + $0x338] sm:$0xff] }
 0x19b   :  { %2083 = vmatprep.subr.bf16.mxu1 %v3111_v15  ;;  %v3057_v15 = vcombine.high %v409_v10, %v413_v11  ;;  %v497_v59 = vld [vmem:[#allocation8 + $0x718] sm:$0xff] }
 0x19c   :  { %v501_v60 = vld [vmem:[#allocation8 + $0x738] sm:$0xff] }
 0x19d   :  { %2043 = vmatpush2.bf16.msra.mxu0 %v2982_v26  ;;  %v2928_v26 = vcombine.low %v281_v8, %v285_v9  ;;  %v361_v0 = vld [vmem:[#allocation8 + $0x2d8] sm:$0xff] }
 0x19e   :  { %2084 = vmatpush2.bf16.msra.mxu1 %v3110_v27  ;;  %2094 = vmatprep.subr.bf16.mxu0 %v2977_v28  ;;  %v3056_v27 = vcombine.low %v409_v10, %v413_v11  ;;  %v2921_v28 = vcombine.high %v273_v16, %v277_v17  ;;  %v365_v1 = vld [vmem:[#allocation8 + $0x2f8] sm:$0xff] }
 0x19f   :  { %2135 = vmatprep.subr.bf16.mxu1 %v3105_v29  ;;  %v3049_v29 = vcombine.high %v401_v18, %v405_v23  ;;  %v489_v2 = vld [vmem:[#allocation8 + $0x6d8] sm:$0xff] }
 0x1a0   :  { %2045 = vmatmul.mubr.bf16.vlgmr.msra.gmra.mxu0 %v3660_v53  ;;  %v493_v3 = vld [vmem:[#allocation8 + $0x6f8] sm:$0xff] }
 0x1a1   :  { %2086 = vmatmul.mubr.bf16.vlgmr.msra.gmra.mxu1 %v3654_v45  ;;  %2095 = vmatpush1.bf16.msra.mxu0 %v2976_v32  ;;  %v521_v32 = vld [vmem:[#allocation8 + $0x7d8] sm:$0xff] }
 0x1a2   :  { %2126 = vmatprep.mubr.bf16.mxu0 %v3656_v51  ;;  %2136 = vmatpush1.bf16.msra.mxu1 %v3104_v35  ;;  %v3081_v51 = vcombine.high %v433_v49, %v437_v50  ;;  %v3048_v35 = vcombine.low %v401_v18, %v405_v23  ;;  %v3169_v37 = vcombine.high %v521_v32, %v525_v33  ;;  %v505_v49 = vld [vmem:[#allocation8 + $0x758] sm:$0xff] }
 0x1a3   :  { %2167 = vmatprep.mubr.bf16.mxu1 %v3658_v52  ;;  %2096 = vmatprep.subr.bf16.mxu0 %v2969_v36  ;;  %v2952_v52 = vcombine.low %v305_v47, %v309_v48  ;;  %v3041_v36 = vcombine.high %v393_v30, %v397_v31  ;;  %v377_v47 = vld [vmem:[#allocation8 + $0x358] sm:$0xff] }
 0x1a4   :  { %2137 = vmatprep.subr.bf16.mxu1 %v3097_v39  ;;  %v389_v39 = vld [vmem:[#allocation8 + $0x3b8] sm:$0xff] }
 0x1a5   :  { %2097 = vmatpush1.bf16.msra.mxu0 %v2968_v42  ;;  %v3040_v42 = vcombine.low %v393_v30, %v397_v31  ;;  %v381_v48 = vld [vmem:[#allocation8 + $0x378] sm:$0xff] }
 0x1a6   :  { %2138 = vmatpush1.bf16.msra.mxu1 %v3096_v43  ;;  %2098 = vmatprep.subr.bf16.mxu0 %v2961_v44  ;;  %v3168_v43 = vcombine.low %v521_v32, %v525_v33  ;;  %v3033_v44 = vcombine.high %v385_v38, %v389_v39  ;;  %v509_v50 = vld [vmem:[#allocation8 + $0x778] sm:$0xff] }
 0x1a7   :  { %2139 = vmatprep.subr.bf16.mxu1 %v3089_v46  ;;  %v3161_v46 = vcombine.high %v513_v40, %v517_v41  ;;  %v353_v8 = vld [vmem:[#allocation8 + $0x298] sm:$0xff] }
 0x1a8   :  { %v357_v9 = vld [vmem:[#allocation8 + $0x2b8] sm:$0xff] }
 0x1a9   :  { %2099 = vmatpush1.bf16.msra.mxu0 %v2960_v54  ;;  %v3032_v54 = vcombine.low %v385_v38, %v389_v39  ;;  %v481_v10 = vld [vmem:[#allocation8 + $0x698] sm:$0xff] }
 0x1aa   :  { %2140 = vmatpush1.bf16.msra.mxu1 %v3088_v55  ;;  %2100 = vmatprep.subr.bf16.mxu0 %v2953_v56  ;;  %v3160_v55 = vcombine.low %v513_v40, %v517_v41  ;;  %v3025_v56 = vcombine.high %v377_v47, %v381_v48  ;;  %v485_v11 = vld [vmem:[#allocation8 + $0x6b8] sm:$0xff]  ;;  %v3349_v40 = vld [vmem:[#allocation11 + $0x78] sm:$0xff]  }
 0x1ab   :  { %2141 = vmatprep.subr.bf16.mxu1 %v3081_v51  ;;  %v3153_v51 = vcombine.high %v505_v49, %v509_v50  ;;  %v345_v16 = vld [vmem:[#allocation8 + $0x258] sm:$0xff]  ;;  %v3365_v41 = vld [vmem:[#allocation11 + $0xf8] sm:$0xff]  }
 0x1ac   :  { %v349_v17 = vld [vmem:[#allocation8 + $0x278] sm:$0xff] }
 0x1ad   :  { %2101 = vmatpush1.bf16.msra.mxu0 %v2952_v52  ;;  %v3024_v52 = vcombine.low %v377_v47, %v381_v48  ;;  %v473_v18 = vld [vmem:[#allocation8 + $0x658] sm:$0xff] }
 0x1ae   :  { %2142 = vmatpush1.bf16.msra.mxu1 %v3080_v61  ;;  %2102 = vmatprep.subr.bf16.mxu0 %v2945_v62  ;;  %v3152_v61 = vcombine.low %v505_v49, %v509_v50  ;;  %v3017_v62 = vcombine.high %v369_v57, %v373_v58  ;;  %v477_v23 = vld [vmem:[#allocation8 + $0x678] sm:$0xff] }
 0x1af   :  { %2143 = vmatprep.subr.bf16.mxu1 %v3073_v63  ;;  %v3145_v63 = vcombine.high %v497_v59, %v501_v60  ;;  %v337_v30 = vld [vmem:[#allocation8 + $0x218] sm:$0xff] }
 0x1b0   :  { %v341_v31 = vld [vmem:[#allocation8 + $0x238] sm:$0xff] }
 0x1b1   :  { %2103 = vmatpush1.bf16.msra.mxu0 %v2944_v4  ;;  %v3016_v4 = vcombine.low %v369_v57, %v373_v58  ;;  %v465_v32 = vld [vmem:[#allocation8 + $0x618] sm:$0xff]  ;;  %v2984_v38 = vcombine.low %v337_v30, %v341_v31 }
 0x1b2   :  { %2144 = vmatpush1.bf16.msra.mxu1 %v3072_v5  ;;  %2104 = vmatprep.subr.bf16.mxu0 %v2937_v6  ;;  %v3144_v5 = vcombine.low %v497_v59, %v501_v60  ;;  %v3009_v6 = vcombine.high %v361_v0, %v365_v1  ;;  %v469_v33 = vld [vmem:[#allocation8 + $0x638] sm:$0xff]  ;;  %v3369_v59 = vld [vmem:[#allocation11 + $0xe8] sm:$0xff]  }
 0x1b3   :  { %2145 = vmatprep.subr.bf16.mxu1 %v3065_v7  ;;  %v3137_v7 = vcombine.high %v489_v2, %v493_v3  ;;  %v3112_v39 = vcombine.low %v465_v32, %v469_v33  ;;  %v3367_v48 = vld [vmem:[#allocation11 + $0xf0] sm:$0xff]  }
 0x1b4   :  { %v3368_v57 = vld [vmem:[#allocation11 + $0xb0] sm:$0xff]  }
 0x1b5   :  { %2105 = vmatpush1.bf16.msra.mxu0 %v2936_v12  ;;  %v3008_v12 = vcombine.low %v361_v0, %v365_v1  ;;  %v3371_v1 = vld [vmem:[#allocation11 + $0xe0] sm:$0xff]  }
 0x1b6   :  { %2146 = vmatpush1.bf16.msra.mxu1 %v3064_v13  ;;  %2106 = vmatprep.subr.bf16.mxu0 %v2929_v14  ;;  %v3136_v13 = vcombine.low %v489_v2, %v493_v3  ;;  %v3001_v14 = vcombine.high %v353_v8, %v357_v9  ;;  %v3356_v3 = vld [vmem:[#allocation11 + $0x20] sm:$0xff]  }
 0x1b7   :  { %2147 = vmatprep.subr.bf16.mxu1 %v3057_v15  ;;  %v3129_v15 = vcombine.high %v481_v10, %v485_v11 }
 0x1b9   :  { %2107 = vmatpush1.bf16.msra.mxu0 %v2928_v26  ;;  %v3000_v26 = vcombine.low %v353_v8, %v357_v9  ;;  %v3359_v9 = vld [vmem:[#allocation11 + $0x50] sm:$0xff]  }
 0x1ba   :  { %2148 = vmatpush1.bf16.msra.mxu1 %v3056_v27  ;;  %2108 = vmatprep.subr.bf16.mxu0 %v2921_v28  ;;  %v3128_v27 = vcombine.low %v481_v10, %v485_v11  ;;  %v2993_v28 = vcombine.high %v345_v16, %v349_v17  ;;  %v3374_v10 = vld [vmem:[#allocation11 + $0x98] sm:$0xff]   ;;  %v3375_v11 = vld [vmem:[#allocation11 + $0xd0] sm:$0xff]  }
 0x1bb   :  { %2149 = vmatprep.subr.bf16.mxu1 %v3049_v29  ;;  %v3121_v29 = vcombine.high %v473_v18, %v477_v23 }
 0x1bd   :  { %2109 = vmatpush1.bf16.msra.mxu0 %v2920_v34  ;;  %v2992_v34 = vcombine.low %v345_v16, %v349_v17  ;;  %v3377_v16 = vld [vmem:[#allocation11 + $0xc8] sm:$0xff]  }
 0x1be   :  { %2150 = vmatpush1.bf16.msra.mxu1 %v3048_v35  ;;  %2110 = vmatprep.subr.bf16.mxu0 %v3041_v36  ;;  %v3120_v35 = vcombine.low %v473_v18, %v477_v23  ;;  %v2985_v36 = vcombine.high %v337_v30, %v341_v31  ;;  %v3362_v17 = vld [vmem:[#allocation11 + $0x8] sm:$0xff]   ;;  %v3381_v30 = vld [vmem:[#allocation11 + $0x178] sm:$0xff]  }
 0x1bf   :  { %2151 = vmatprep.subr.bf16.mxu1 %v3169_v37  ;;  %v3113_v37 = vcombine.high %v465_v32, %v469_v33  ;;  %v3378_v23 = vld [vmem:[#allocation11 + $0x88] sm:$0xff]   ;;  %v3397_v31 = vld [vmem:[#allocation11 + $0x1f8] sm:$0xff]  }
 0x1c0   :  { %v3382_v32 = vld [vmem:[#allocation11 + $0x138] sm:$0xff]  }
 0x1c1   :  { %2111 = vmatpush2.bf16.msra.mxu0 %v3040_v42  ;;  %v3350_v42 = vld [vmem:[#allocation11 + $0x38] sm:$0xff]  }
 0x1c2   :  { %2152 = vmatpush2.bf16.msra.mxu1 %v3168_v43  ;;  %2112 = vmatprep.subr.bf16.mxu0 %v3033_v44  ;;  %v3676_v43 = vld [vmem:[#allocation10] sm:$0xff]  ;;  %v3351_v44 = vld [vmem:[#allocation11 + $0x70] sm:$0xff]  }
 0x1c3   :  { %2153 = vmatprep.subr.bf16.mxu1 %v3161_v46  ;;  %v3366_v46 = vld [vmem:[#allocation11 + $0xb8] sm:$0xff]   ;;  %v535_v47 = vrot.slane %v3676_v43, %v122_v24  ;;  %v531_v8 = vrot.slane %v3676_v43, %v118_v21  ;;  %v3363_v21 = vld [vmem:[#allocation11 + $0x40] sm:$0xff]  }
 0x1c5   :  { %2113 = vmatpush2.bf16.msra.mxu0 %v3032_v54  ;;  %v3352_v54 = vld [vmem:[#allocation11 + $0x30] sm:$0xff]  }
 0x1c6   :  { %2154 = vmatpush2.bf16.msra.mxu1 %v3160_v55  ;;  %2114 = vmatprep.subr.bf16.mxu0 %v3025_v56 }
 0x1c7   :  { %2155 = vmatprep.subr.bf16.mxu1 %v3153_v51  ;;  %v3353_v51 = vld [vmem:[#allocation11 + $0x68] sm:$0xff]  }
 0x1c9   :  { %2115 = vmatpush2.bf16.msra.mxu0 %v3024_v52 }
 0x1ca   :  { %2156 = vmatpush2.bf16.msra.mxu1 %v3152_v61  ;;  %2116 = vmatprep.subr.bf16.mxu0 %v3017_v62 }
 0x1cb   :  { %2157 = vmatprep.subr.bf16.mxu1 %v3145_v63  ;;  %v3370_v63 = vld [vmem:[#allocation11 + $0xa8] sm:$0xff]  }
 0x1cd   :  { %2117 = vmatpush2.bf16.msra.mxu0 %v3016_v4  ;;  %v3357_v4 = vld [vmem:[#allocation11 + $0x58] sm:$0xff]  }
 0x1ce   :  { %2158 = vmatpush2.bf16.msra.mxu1 %v3144_v5  ;;  %2118 = vmatprep.subr.bf16.mxu0 %v3009_v6  ;;  %v3372_v5 = vld [vmem:[#allocation11 + $0xa0] sm:$0xff]   ;;  %v3373_v6 = vld [vmem:[#allocation11 + $0xd8] sm:$0xff]  }
 0x1cf   :  { %2159 = vmatprep.subr.bf16.mxu1 %v3137_v7  ;;  %v3358_v7 = vld [vmem:[#allocation11 + $0x18] sm:$0xff]  }
 0x1d1   :  { %2119 = vmatpush2.bf16.msra.mxu0 %v3008_v12  ;;  %v3360_v12 = vld [vmem:[#allocation11 + $0x10] sm:$0xff]  }
 0x1d2   :  { %2160 = vmatpush2.bf16.msra.mxu1 %v3136_v13  ;;  %2120 = vmatprep.subr.bf16.mxu0 %v3001_v14  ;;  %v3361_v14 = vld [vmem:[#allocation11 + $0x48] sm:$0xff]  }
 0x1d3   :  { %2161 = vmatprep.subr.bf16.mxu1 %v3129_v15  ;;  %v3376_v15 = vld [vmem:[#allocation11 + $0x90] sm:$0xff]  }
 0x1d5   :  { %2121 = vmatpush2.bf16.msra.mxu0 %v3000_v26  ;;  %v3379_v26 = vld [vmem:[#allocation11 + $0xc0] sm:$0xff]  }
 0x1d6   :  { %2162 = vmatpush2.bf16.msra.mxu1 %v3128_v27  ;;  %2122 = vmatprep.subr.bf16.mxu0 %v2993_v28  ;;  %v3364_v27 = vld [vmem:[#allocation11] sm:$0xff]  }
 0x1d7   :  { %2163 = vmatprep.subr.bf16.mxu1 %v3121_v29  ;;  %v3380_v29 = vld [vmem:[#allocation11 + $0x80] sm:$0xff]  }
 0x1d9   :  { %2123 = vmatpush2.bf16.msra.mxu0 %v2992_v34  ;;  %v3383_v34 = vld [vmem:[#allocation11 + $0x170] sm:$0xff]  }
 0x1da   :  { %2164 = vmatpush2.bf16.msra.mxu1 %v3120_v35  ;;  %2124 = vmatprep.subr.bf16.mxu0 %v2985_v36  ;;  %v3384_v35 = vld [vmem:[#allocation11 + $0x130] sm:$0xff]   ;;  %v3385_v36 = vld [vmem:[#allocation11 + $0x168] sm:$0xff]  }
 0x1db   :  { %2165 = vmatprep.subr.bf16.mxu1 %v3113_v37  ;;  %v3386_v37 = vld [vmem:[#allocation11 + $0x128] sm:$0xff]  }
 0x1dd   :  { %2125 = vmatpush2.bf16.msra.mxu0 %v2984_v38  ;;  %v3387_v38 = vld [vmem:[#allocation11 + $0x160] sm:$0xff]  }
 0x1de   :  { %2166 = vmatpush2.bf16.msra.mxu1 %v3112_v39  ;;  %3235 = vmatprep.subr.bf16.mxu0 %v3349_v40  ;;  %v3388_v39 = vld [vmem:[#allocation11 + $0x120] sm:$0xff]   ;;  %v3389_v40 = vld [vmem:[#allocation11 + $0x158] sm:$0xff]  }
 0x1df   :  { %3257 = vmatprep.subr.bf16.mxu1 %v3365_v41  ;;  %v3390_v41 = vld [vmem:[#allocation11 + $0x118] sm:$0xff]  }
 0x1e0   :  { %2127 = vmatmul.mubr.bf16.vlgmr.msra.gmra.mxu0 %v3660_v53  ;;  %v1882_v49 = vpop.f32.mrf.mxu0  ;;  %v3354_v53 = vld [vmem:[#allocation11 + $0x28] sm:$0xff]  }
 0x1e1   :  { %v1923_v50 = vpop.f32.mrf.mxu1  ;;  %2168 = vmatmul.mubr.bf16.vlgmr.msra.gmra.mxu1 %v3654_v45  ;;  %3236 = vmatpush3.bf16.msra.mxu0 %v3350_v42  ;;  %v3355_v45 = vld [vmem:[#allocation11 + $0x60] sm:$0xff]   ;;  %v1883_v13 = vadd.f32 %v1882_v49, %v531_v8  ;;  %v3391_v42 = vld [vmem:[#allocation11 + $0x150] sm:$0xff]   ;;  %v3406_v8 = vld [vmem:[#allocation11 + $0x198] sm:$0xff]  }
 0x1e2   :  { %v1884_v55 = vpop.f32.mrf.mxu0  ;;  %3237 = vmatprep.subr.bf16.mxu0 %v3351_v44  ;;  %3258 = vmatpush3.bf16.msra.mxu1 %v3366_v46  ;;  %v3392_v44 = vld [vmem:[#allocation11 + $0x110] sm:$0xff]   ;;  %v3393_v46 = vld [vmem:[#allocation11 + $0x148] sm:$0xff]   ;;  %v3396_v49 = vld [vmem:[#allocation11 + $0x100] sm:$0xff]  }
 0x1e3   :  { %v1925_v56 = vpop.f32.mrf.mxu1  ;;  %v1885_v58 = vadd.f32 %v1884_v55, %v535_v47  ;;  %3259 = vmatprep.subr.bf16.mxu1 %v3367_v48  ;;  %v1924_v18 = vadd.f32 %v1923_v50, %v1883_v13  ;;  %v3394_v47 = vld [vmem:[#allocation11 + $0x108] sm:$0xff]   ;;  %v3395_v48 = vld [vmem:[#allocation11 + $0x140] sm:$0xff]   ;;  %v539_v50 = vrot.slane %v3676_v43, %v126_v22 }
 0x1e4   :  { %v1886_v24 = vpop.f32.mrf.mxu0  ;;  %v3411_v13 = vld [vmem:[#allocation11 + $0x1c0] sm:$0xff]  }
 0x1e5   :  { %v1927_v60 = vpop.f32.mrf.mxu1  ;;  %v1926_v52 = vadd.f32 %v1925_v56, %v1885_v58  ;;  %3238 = vmatpush3.bf16.msra.mxu0 %v3352_v54  ;;  %v2176_v28 = vmax.f32 %v1924_v18, 0.0  ;;  %v543_v54 = vrot.slane %v3676_v43, %v130_v25  ;;  %v3400_v25 = vld [vmem:[#allocation11 + $0x1b0] sm:$0xff]  }
 0x1e6   :  { %v1887_v61 = vpop.f32.mrf.mxu0  ;;  %3239 = vmatprep.subr.bf16.mxu0 %v3353_v51  ;;  %3260 = vmatpush3.bf16.msra.mxu1 %v3368_v57 }
 0x1e7   :  { %v1928_v62 = vpop.f32.mrf.mxu1  ;;  %v2177_v0 = vmax.f32 %v1926_v52, 0.0  ;;  %3261 = vmatprep.subr.bf16.mxu1 %v3369_v59  ;;  %v2184_v33 = vpack.c.bf16 %v2176_v28, %v2176_v28 }
 0x1e9   :  { %v2185_v2 = vpack.c.bf16 %v2177_v0, %v2177_v0  ;;  %3240 = vmatpush3.bf16.msra.mxu0 %v3354_v53  ;;  %v3398_v0 = vld [vmem:[#allocation11 + $0x1b8] sm:$0xff]  }
 0x1ea   :  { %3241 = vmatprep.subr.bf16.mxu0 %v3355_v45  ;;  %3262 = vmatpush3.bf16.msra.mxu1 %v3370_v63 }
 0x1eb   :  { %2743 = vmatprep.mubr.bf16.mxu0 %v2185_v2  ;;  %3263 = vmatprep.subr.bf16.mxu1 %v3371_v1  ;;  %v3399_v2 = vld [vmem:[#allocation11 + $0x1f0] sm:$0xff]  }
 0x1ed   :  { %3242 = vmatpush3.bf16.msra.mxu0 %v3356_v3  ;;  %v3401_v3 = vld [vmem:[#allocation11 + $0x1e8] sm:$0xff]  }
 0x1ee   :  { %3243 = vmatprep.subr.bf16.mxu0 %v3357_v4  ;;  %3264 = vmatpush3.bf16.msra.mxu1 %v3372_v5  ;;  %v3402_v4 = vld [vmem:[#allocation11 + $0x1a8] sm:$0xff]   ;;  %v3403_v5 = vld [vmem:[#allocation11 + $0x1e0] sm:$0xff]  }
 0x1ef   :  { %3265 = vmatprep.subr.bf16.mxu1 %v3373_v6  ;;  %v3404_v6 = vld [vmem:[#allocation11 + $0x1a0] sm:$0xff]  }
 0x1f1   :  { %3244 = vmatpush3.bf16.msra.mxu0 %v3358_v7  ;;  %v3405_v7 = vld [vmem:[#allocation11 + $0x1d8] sm:$0xff]  }
 0x1f2   :  { %3245 = vmatprep.subr.bf16.mxu0 %v3359_v9  ;;  %3266 = vmatpush3.bf16.msra.mxu1 %v3374_v10  ;;  %v3407_v9 = vld [vmem:[#allocation11 + $0x1d0] sm:$0xff]  }
 0x1f3   :  { %3267 = vmatprep.subr.bf16.mxu1 %v3375_v11  ;;  %v3408_v10 = vld [vmem:[#allocation11 + $0x190] sm:$0xff]   ;;  %v3409_v11 = vld [vmem:[#allocation11 + $0x1c8] sm:$0xff]  }
 0x1f5   :  { %3246 = vmatpush3.bf16.msra.mxu0 %v3360_v12  ;;  %v3410_v12 = vld [vmem:[#allocation11 + $0x188] sm:$0xff]  }
 0x1f6   :  { %3247 = vmatprep.subr.bf16.mxu0 %v3361_v14  ;;  %3268 = vmatpush3.bf16.msra.mxu1 %v3376_v15  ;;  %v3412_v14 = vld [vmem:[#allocation11 + $0x180] sm:$0xff]   ;;  %v546_v15 = vsub.s32 4, %v3640_v20 }
 0x1f7   :  { %3269 = vmatprep.subr.bf16.mxu1 %v3377_v16  ;;  %v550_v16 = vsub.s32 5, %v3640_v20 }
 0x1f9   :  { %3248 = vmatpush3.bf16.msra.mxu0 %v3362_v17  ;;  %v547_v17 = vrot.slane %v3676_v43, %v546_v15  ;;  %v551_v18 = vrot.slane %v3676_v43, %v550_v16 }
 0x1fa   :  { %3249 = vmatprep.subr.bf16.mxu0 %v3363_v21  ;;  %3270 = vmatpush3.bf16.msra.mxu1 %v3378_v23 }
 0x1fb   :  { %3271 = vmatprep.subr.bf16.mxu1 %v3379_v26 }
 0x1fd   :  { %3250 = vmatpush3.bf16.msra.mxu0 %v3364_v27 }
 0x1fe   :  { %3272 = vmatpush3.bf16.msra.mxu1 %v3380_v29  ;;  %3279 = vmatprep.subr.bf16.mxu0 %v3381_v30 }
 0x1ff   :  { %3301 = vmatprep.subr.bf16.mxu1 %v3397_v31 }
 0x200   :  { %2744 = vmatmul.mubr.bf16.vlgmr.msra.gmra.mxu0 %v2184_v33 }
 0x201   :  { %3280 = vmatpush3.bf16.msra.mxu0 %v3382_v32 }
 0x202   :  { %3281 = vmatprep.subr.bf16.mxu0 %v3383_v34 }
 0x205   :  { %3282 = vmatpush3.bf16.msra.mxu0 %v3384_v35 }
 0x206   :  { %3283 = vmatprep.subr.bf16.mxu0 %v3385_v36 }
 0x209   :  { %3284 = vmatpush3.bf16.msra.mxu0 %v3386_v37 }
 0x20a   :  { %3285 = vmatprep.subr.bf16.mxu0 %v3387_v38 }
 0x20d   :  { %3286 = vmatpush3.bf16.msra.mxu0 %v3388_v39 }
 0x20e   :  { %3287 = vmatprep.subr.bf16.mxu0 %v3389_v40  ;;  %v554_v40 = vsub.s32 6, %v3640_v20 }
 0x211   :  { %3288 = vmatpush3.bf16.msra.mxu0 %v3390_v41  ;;  %v558_v41 = vsub.s32 7, %v3640_v20 }
 0x212   :  { %3289 = vmatprep.subr.bf16.mxu0 %v3391_v42  ;;  %v555_v42 = vrot.slane %v3676_v43, %v554_v40 }
 0x215   :  { %3290 = vmatpush3.bf16.msra.mxu0 %v3392_v44  ;;  %v559_v44 = vrot.slane %v3676_v43, %v558_v41 }
 0x216   :  { %3291 = vmatprep.subr.bf16.mxu0 %v3393_v46 }
 0x219   :  { %3292 = vmatpush3.bf16.msra.mxu0 %v3394_v47 }
 0x21a   :  { %3293 = vmatprep.subr.bf16.mxu0 %v3395_v48 }
 0x21d   :  { %3294 = vmatpush3.bf16.msra.mxu0 %v3396_v49 }
 0x220   :  { %v1964_v55 = vpop.f32.mrf.mxu0 }
 0x221   :  { %v2005_v56 = vpop.f32.mrf.mxu1  ;;  %v1965_v51 = vadd.f32 %v1964_v55, %v539_v50 }
 0x222   :  { %v1966_v57 = vpop.f32.mrf.mxu0 }
 0x223   :  { %v2007_v58 = vpop.f32.mrf.mxu1  ;;  %v2006_v59 = vadd.f32 %v2005_v56, %v1965_v51  ;;  %v1967_v24 = vadd.f32 %v1966_v57, %v543_v54 }
 0x224   :  { %v1968_v60 = vpop.f32.mrf.mxu0 }
 0x225   :  { %v2009_v52 = vpop.f32.mrf.mxu1  ;;  %v2008_v53 = vadd.f32 %v2007_v58, %v1967_v24  ;;  %v2178_v61 = vmax.f32 %v2006_v59, 0.0 }
 0x226   :  { %v1969_v62 = vpop.f32.mrf.mxu0 }
 0x227   :  { %v2010_v45 = vpop.f32.mrf.mxu1  ;;  %v2179_v63 = vmax.f32 %v2008_v53, 0.0  ;;  %v2186_v1 = vpack.c.bf16 %v2178_v61, %v2178_v61 }
 0x229   :  { %v2187_v22 = vpack.c.bf16 %v2179_v63, %v2179_v63  ;;  %v3170_v63 = vld [vmem:[%s3713_s6] ss:$0 sm:$0xff]  ;;  %s3580_s6 = smov [#allocation13]  }
 0x22a   :  { %s2892_s10 = sshll.u32 %s3580_s6, 4  ;;  %s2893_s10 = int_to_ptr.vmem [resolvable:$true] %s2892_s10 }
 0x22b   :  { %2783 = vmatprep.mubr.bf16.mxu1 %v2187_v22  ;;  %s3537_s11 = scalar_lea.vmem %s2893_s10, 128  ;;  %p3542_p3 = scmp.lt.s32.totalorder %s2893_s10, %s2893_s10 }
 0x22c   :  { %2784 = vmatmul.mubr.bf16.vlgmr.msra.gmra.mxu1 %v2186_v1  ;;  %p3538_p2 = scmp.ne.s32.totalorder %s2893_s10, %s3537_s11  ;;  %p3543_p4 = scmp.lt.s32.totalorder %s3537_s11, %s3537_s11 }
 0x22d   :  { %3302 = vmatpush3.bf16.msra.mxu1 %v3398_v0 }
 0x22e   :  { %3303 = vmatprep.subr.bf16.mxu1 %v3399_v2  ;;  %p3544_p5 = por %p3543_p4, %p3542_p3 }
 0x230   :  { %p3545_p6 = pnand %p3544_p5, %p3538_p2 }
 0x231   :  { %3304 = vmatpush3.bf16.msra.mxu1 %v3400_v25 }
 0x232   :  { %3305 = vmatprep.subr.bf16.mxu1 %v3401_v3 }
 0x235   :  { %3306 = vmatpush3.bf16.msra.mxu1 %v3402_v4 }
 0x236   :  { %3307 = vmatprep.subr.bf16.mxu1 %v3403_v5 }
 0x239   :  { %3308 = vmatpush3.bf16.msra.mxu1 %v3404_v6 }
 0x23a   :  { %3309 = vmatprep.subr.bf16.mxu1 %v3405_v7 }
 0x23d   :  { %3310 = vmatpush3.bf16.msra.mxu1 %v3406_v8 }
 0x23e   :  { %3311 = vmatprep.subr.bf16.mxu1 %v3407_v9 }
 0x241   :  { %3312 = vmatpush3.bf16.msra.mxu1 %v3408_v10 }
 0x242   :  { %3313 = vmatprep.subr.bf16.mxu1 %v3409_v11 }
 0x245   :  { %3314 = vmatpush3.bf16.msra.mxu1 %v3410_v12  ;;  %v2872_v12 = vand.u32 127, %v116_v19 }
 0x246   :  { %3315 = vmatprep.subr.bf16.mxu1 %v3411_v13 }
 0x247   :  { %vm2873_vm1 = vcmp.lt.s32.totalorder %v2872_v12, 2 }
 0x249   :  { %3316 = vmatpush3.bf16.msra.mxu1 %v3412_v14 }
 0x260   :  { %v2046_v21 = vpop.f32.mrf.mxu0 }
 0x261   :  { %v2047_v23 = vadd.f32 %v2046_v21, %v547_v17  ;;  %v2087_v26 = vpop.f32.mrf.mxu1 }
 0x262   :  { %v2048_v27 = vpop.f32.mrf.mxu0 }
 0x263   :  { %v2088_v28 = vadd.f32 %v2087_v26, %v2047_v23  ;;  %v2049_v29 = vadd.f32 %v2048_v27, %v551_v18  ;;  %v2089_v30 = vpop.f32.mrf.mxu1 }
 0x264   :  { %v2050_v31 = vpop.f32.mrf.mxu0 }
 0x265   :  { %v2090_v32 = vadd.f32 %v2089_v30, %v2049_v29  ;;  %v2091_v33 = vpop.f32.mrf.mxu1  ;;  %v2180_v34 = vmax.f32 %v2088_v28, 0.0 }
 0x266   :  { %v2051_v35 = vpop.f32.mrf.mxu0 }
 0x267   :  { %v2181_v36 = vmax.f32 %v2090_v32, 0.0  ;;  %v2092_v37 = vpop.f32.mrf.mxu1  ;;  %v2188_v39 = vpack.c.bf16 %v2180_v34, %v2180_v34 }
 0x269   :  { %v2189_v38 = vpack.c.bf16 %v2181_v36, %v2181_v36 }
 0x26b   :  { %2823 = vmatprep.mubr.bf16.mxu0 %v2189_v38 }
 0x26c   :  { %2824 = vmatmul.mubr.bf16.vlgmr.msra.gmra.mxu0 %v2188_v39 }
 0x2a0   :  { %v2128_v46 = vpop.f32.mrf.mxu0 }
 0x2a1   :  { %v2129_v47 = vadd.f32 %v2128_v46, %v555_v42  ;;  %v2169_v48 = vpop.f32.mrf.mxu1 }
 0x2a2   :  { %v2130_v49 = vpop.f32.mrf.mxu0 }
 0x2a3   :  { %v2170_v50 = vadd.f32 %v2169_v48, %v2129_v47  ;;  %v2131_v54 = vadd.f32 %v2130_v49, %v559_v44  ;;  %v2171_v55 = vpop.f32.mrf.mxu1 }
 0x2a4   :  { %v2132_v56 = vpop.f32.mrf.mxu0 }
 0x2a5   :  { %v2172_v51 = vadd.f32 %v2171_v55, %v2131_v54  ;;  %v2173_v57 = vpop.f32.mrf.mxu1  ;;  %v2182_v58 = vmax.f32 %v2170_v50, 0.0 }
 0x2a6   :  { %v2133_v59 = vpop.f32.mrf.mxu0 }
 0x2a7   :  { %v2183_v24 = vmax.f32 %v2172_v51, 0.0  ;;  %v2174_v60 = vpop.f32.mrf.mxu1  ;;  %v2190_v20 = vpack.c.bf16 %v2182_v58, %v2182_v58 }
 0x2a9   :  { %v2191_v52 = vpack.c.bf16 %v2183_v24, %v2183_v24 }
 0x2ab   :  { %2863 = vmatprep.mubr.bf16.mxu1 %v2191_v52 }
 0x2ac   :  { %2864 = vmatmul.mubr.bf16.vlgmr.msra.gmra.mxu1 %v2190_v20 }
 0x2c0   :  { %v3251_v53 = vpop.f32.mrf.mxu0 }
 0x2c2   :  { %v3252_v43 = vpop.f32.mrf.mxu0 }
 0x2c3   :  { %v3253_v61 = vadd.f32 %v3252_v43, %v3251_v53 }
 0x2c4   :  { %v3254_v62 = vpop.f32.mrf.mxu0 }
 0x2c5   :  { %v2746_v1 = vadd.f32 %v3253_v61, %v3170_v63 }
 0x2c6   :  { %v3255_v45 = vpop.f32.mrf.mxu0 }
 0x2ec   :  { %v3273_v22 = vpop.f32.mrf.mxu1 }
 0x2ee   :  { %v3274_v0 = vpop.f32.mrf.mxu1 }
 0x2ef   :  { %v3275_v2 = vadd.f32 %v3274_v0, %v3273_v22 }
 0x2f0   :  { %v3276_v25 = vpop.f32.mrf.mxu1 }
 0x2f1   :  { %v2786_v3 = vadd.f32 %v3275_v2, %v2746_v1 }
 0x2f2   :  { %v3277_v4 = vpop.f32.mrf.mxu1 }
 0x32c   :  { %v3295_v5 = vpop.f32.mrf.mxu0 }
 0x32e   :  { %v3296_v6 = vpop.f32.mrf.mxu0 }
 0x32f   :  { %v3297_v7 = vadd.f32 %v3296_v6, %v3295_v5 }
 0x330   :  { %v3298_v8 = vpop.f32.mrf.mxu0 }
 0x331   :  { %v2826_v9 = vadd.f32 %v3297_v7, %v2786_v3 }
 0x332   :  { %v3299_v10 = vpop.f32.mrf.mxu0 }
 0x36c   :  { %v3317_v11 = vpop.f32.mrf.mxu1 }
 0x36e   :  { %v3318_v13 = vpop.f32.mrf.mxu1 }
 0x36f   :  { %v3319_v14 = vadd.f32 %v3318_v13, %v3317_v11 }
 0x370   :  { %v3320_v15 = vpop.f32.mrf.mxu1 }
 0x371   :  { %v2866_v16 = vadd.f32 %v3319_v14, %v2826_v9 }
 0x372   :  { %v3321_v17 = vpop.f32.mrf.mxu1 }
 0x373   :  { %v2874_v18 = vsel %vm2873_vm1, %v2866_v16, -1e+30 }
 0x374   :  { %2875 = vmax.xlane.f32.xlu0 %v2874_v18 }
 0x3fd   :  { %v2876_v21 = vpop.xlane.xlu0 %2875 }
 0x3fe   :  { %v2877_v23 = vsub.f32 %v2874_v18, %v2876_v21 }
 0x400   :  { %v2878_v26 = vmul.f32 1.442695, %v2877_v23 }
 0x402   :  { %3413 = vpow2.f32 %v2878_v26 }
 0x40f   :  { %v3414_v27 = vpop.eup %3413 }
 0x410   :  { %2880 = vadd.xlane.f32.xlu0 %v3414_v27 }
 0x499   :  { %v2881_v28 = vpop.xlane.xlu0 %2880 }
 0x49a   :  { %3415 = vlog2.f32 %v2881_v28 }
 0x4a7   :  { %v3416_v29 = vpop.eup %3415 }
 0x4a8   :  { %v2883_v19 = vmul.f32 0.6931472, %v3416_v29 }
 0x4aa   :  { %v2884_v30 = vsub.f32 %v2877_v23, %v2883_v19 }
 0x4ac   :  { %2885 = vst [vmem:[#allocation13] sm:$0xff] %v2884_v30 }
 0x4ad   :  { %3548 = shalt.err (!%p3545_p6)
}
 0x4ae   :  { %2895 = dma.vmem_to_hbm [thread:$0]  %s2893_s10, 128, %s3714_s7, [#allocation4]  }
 0x4af   :  { %3565 = dma.done.wait [#allocation4], 128  }
 0x4b0   :  { %3566 = vsyncadd [#allocation4], 4294967168 }
 0x4b1   :  { %2899 = vsyncpa [#allocation3], 1 }
 0x4b2   :  { %2900 = vsyncpa [#allocation6], 1 }
 0x4b3   :  { %2901 = vsyncpa [#allocation9], 1 }
 0x4b4   :  { %2902 = vsyncpa [#allocation12], 1 }
 0x4b5   :  { %2903 = vsyncpa [#allocation4], 1 }

</bundles_post_ra>
